<compile_context>
chip_gen: v7x
topology: tpu7x:2x2x1
jax: 0.10.0
libtpu: 0.0.40
codegen_flags: <defaults>
</compile_context>

<pallas_src>
import functools

import jax
import jax.numpy as jnp
from jax import lax
from jax.experimental import pallas as pl
from jax.experimental.pallas import tpu as pltpu

K = 7            # conv kernel size
PAD = 3          # conv padding (PyTorch padding=3)
NUM_ACC = 4      # independent partial accumulators for the tap loop


def _round_up(x, m):
    return (x + m - 1) // m * m


def _spatial_attn_kernel(x_ref, w_ref, b_ref, o_ref, pad_ref, *, C):
    # x_ref  : (1, Cblk, H, W)  VMEM input block
    # w_ref  : (2*K*K,)         SMEM flattened conv weight (channel-major)
    # b_ref  : (1,)             SMEM conv bias
    # o_ref  : (1, 1, H, W)     VMEM output block (written at last channel step)
    # pad_ref: (2, HP, WP)      VMEM scratch: zero-padded [avg, max] planes
    c = pl.program_id(1)
    nc = pl.num_programs(1)

    H = x_ref.shape[2]
    W = x_ref.shape[3]
    WP = pad_ref.shape[2]

    xb = x_ref[0]                                    # (Cblk, H, W)
    psum = jnp.sum(xb, axis=0, dtype=jnp.float32)    # partial channel sum (H, W)
    pmax = jnp.max(xb, axis=0).astype(jnp.float32)   # partial channel max (H, W)

    @pl.when(c == 0)
    def _init():
        # Zero the whole padded scratch (border must be 0 for the conv), then
        # seed the running sum/max with the first channel block.
        pad_ref[...] = jnp.zeros_like(pad_ref)
        pad_ref[0, PAD:PAD + H, PAD:PAD + W] = psum
        pad_ref[1, PAD:PAD + H, PAD:PAD + W] = pmax

    @pl.when(c > 0)
    def _accumulate():
        pad_ref[0, PAD:PAD + H, PAD:PAD + W] += psum
        pad_ref[1, PAD:PAD + H, PAD:PAD + W] = jnp.maximum(
            pad_ref[1, PAD:PAD + H, PAD:PAD + W], pmax)

    @pl.when(c == nc - 1)
    def _finalize():
        # Hoist all SMEM scalar reads out of the tap loops.
        w_list = [w_ref[i] for i in range(2 * K * K)]
        bias = b_ref[0]

        avg_p = pad_ref[0] * jnp.float32(1.0 / C)    # (HP, WP); border stays 0
        max_p = pad_ref[1]                           # (HP, WP)
        feats = (avg_p, max_p)

        # Independent partial accumulators (full lane width).
        accs = [jnp.full((H, WP), bias, jnp.float32)] + [
            jnp.zeros((H, WP), jnp.float32) for _ in range(NUM_ACC - 1)
        ]

        t = 0
        for ci in range(2):
            fp = feats[ci]
            for kh in range(K):
                rowblk = fp[kh:kh + H, :]            # (H, WP) row block
                for kw in range(K):
                    wv = w_list[ci * K * K + kh * K + kw]
                    # kw shift as an XLU lane rotation; wrap-around lands in the
                    # zero / unused lanes (> W + 2*PAD), never in columns < W.
                    tap = rowblk if kw == 0 else pltpu.roll(rowblk, WP - kw, axis=1)
                    accs[t % NUM_ACC] = accs[t % NUM_ACC] + wv * tap
                    t += 1

        acc = (accs[0] + accs[1]) + (accs[2] + accs[3])
        o_ref[0, 0] = jax.nn.sigmoid(acc[:, :W]).astype(o_ref.dtype)


def spatial_attention(x, weight, bias, *, c_block=None):
    """x: (N, C, H, W), weight: (1, 2, 7, 7), bias: (1,) -> (N, 1, H, W)."""
    N, C, H, W = x.shape
    assert weight.shape == (1, 2, K, K)
    assert W + 2 * PAD <= 128, "width tiling for W + 6 > 128 not implemented"

    HP = _round_up(H + 2 * PAD, 8)       # sublane-aligned padded height
    WP = _round_up(W + 2 * PAD, 128)     # lane-aligned padded width

    if c_block is None:
        if C <= 256:
            c_block = C
        else:
            c_block = next(cb for cb in range(256, 0, -1) if C % cb == 0)
    assert C % c_block == 0
    nc = C // c_block

    w_flat = weight.reshape(-1).astype(jnp.float32)   # (2*K*K,)
    b = bias.reshape(-1).astype(jnp.float32)          # (1,)

    kernel = functools.partial(_spatial_attn_kernel, C=C)

    # Explicit VMEM budget: double-buffered input + output blocks + scratch.
    in_block_bytes = c_block * H * W * x.dtype.itemsize
    out_block_bytes = H * W * 4
    scratch_bytes = 2 * HP * WP * 4
    vmem_limit = int(min(
        64 * 1024 * 1024,
        max(4 * 1024 * 1024,
            2 * in_block_bytes + 2 * out_block_bytes + scratch_bytes
            + 2 * 1024 * 1024)))

    return pl.pallas_call(
        kernel,
        out_shape=jax.ShapeDtypeStruct((N, 1, H, W), jnp.float32),
        grid_spec=pltpu.PrefetchScalarGridSpec(
            num_scalar_prefetch=0,
            grid=(N, nc),
            in_specs=[
                pl.BlockSpec((1, c_block, H, W), lambda n, c: (n, c, 0, 0)),
                pl.BlockSpec(memory_space=pltpu.MemorySpace.SMEM),
                pl.BlockSpec(memory_space=pltpu.MemorySpace.SMEM),
            ],
            out_specs=pl.BlockSpec((1, 1, H, W), lambda n, c: (n, 0, 0, 0)),
            scratch_shapes=[pltpu.VMEM((2, HP, WP), jnp.float32)],
        ),
        compiler_params=pltpu.CompilerParams(
            dimension_semantics=("parallel", "arbitrary"),
            vmem_limit_bytes=vmem_limit,
        ),
    )(x, w_flat, b)


def reference(x, weight, bias):
    avg = jnp.mean(x, axis=1, keepdims=True)
    mx = jnp.max(x, axis=1, keepdims=True)
    out = jnp.concatenate([avg, mx], axis=1)
    out = lax.conv_general_dilated(
        out, weight, window_strides=(1, 1), padding=((PAD, PAD), (PAD, PAD)),
        dimension_numbers=("NCHW", "OIHW", "NCHW"))
    out = out + bias.reshape(1, 1, 1, 1)
    return jax.nn.sigmoid(out)


if __name__ == "__main__":
    key = jax.random.PRNGKey(0)
    kx, kw, kb = jax.random.split(key, 3)

    N, C, H, W = 2, 4, 16, 16
    x = jax.random.normal(kx, (N, C, H, W), dtype=jnp.float32)

    # PyTorch-like fan-in uniform init for conv2d(2 -> 1, k=7).
    fan_in = 2 * K * K
    bound = 1.0 / (fan_in ** 0.5)
    weight = jax.random.uniform(kw, (1, 2, K, K), jnp.float32, -bound, bound)
    bias = jax.random.uniform(kb, (1,), jnp.float32, -bound, bound)

    out = spatial_attention(x, weight, bias)
    out = jax.block_until_ready(out)

    ref = reference(x, weight, bias)
    assert out.shape == (N, 1, H, W)
    assert jnp.allclose(out, ref, atol=1e-5, rtol=1e-5)

    print("KERNEL_OK")
</pallas_src>

<mosaic_0001>
module attributes {stable_mosaic.version = 11 : i64} {
  func.func @_spatial_attn_kernel(%arg0: i32, %arg1: i32, %arg2: memref<1x4x16x16xf32, #tpu.memory_space<vmem>>, %arg3: memref<98xf32, #tpu.memory_space<smem>>, %arg4: memref<1xf32, #tpu.memory_space<smem>>, %arg5: memref<1x1x16x16xf32, #tpu.memory_space<vmem>>, %arg6: memref<2x24x128xf32, #tpu.memory_space<vmem>>) attributes {dimension_semantics = [#tpu.dimension_semantics<parallel>, #tpu.dimension_semantics<arbitrary>], iteration_bounds = array<i64: 2, 1>, scalar_prefetch = 0 : i64, scratch_operands = 1 : i64, tpu.core_type = #tpu.core_type<tc>, window_params = [{transform_indices = @transform_0, window_bounds = array<i64: 1, 4, 16, 16>}, {transform_indices = @transform_1, window_bounds = array<i64: 98>}, {transform_indices = @transform_2, window_bounds = array<i64: 1>}, {transform_indices = @transform_3, window_bounds = array<i64: 1, 1, 16, 16>}]} {
    %c0 = arith.constant 0 : index
    %c0_0 = arith.constant 0 : index
    %c0_1 = arith.constant 0 : index
    %c0_2 = arith.constant 0 : index
    %0 = vector.load %arg2[%c0, %c0_0, %c0_1, %c0_2] : memref<1x4x16x16xf32, #tpu.memory_space<vmem>>, vector<1x4x16x16xf32>
    %1 = vector.shape_cast %0 : vector<1x4x16x16xf32> to vector<4x16x16xf32>
    %cst = arith.constant dense<0.000000e+00> : vector<16x16xf32>
    %2 = vector.multi_reduction <add>, %1, %cst [0] : vector<4x16x16xf32> to vector<16x16xf32>
    %cst_3 = arith.constant dense<0xFF800000> : vector<16x16xf32>
    %3 = vector.multi_reduction <maximumf>, %1, %cst_3 [0] : vector<4x16x16xf32> to vector<16x16xf32>
    %c0_i32 = arith.constant 0 : i32
    %4 = arith.cmpi eq, %arg1, %c0_i32 : i32
    %5 = arith.extui %4 : i1 to i32
    %c0_i32_4 = arith.constant 0 : i32
    %6 = arith.cmpi ne, %5, %c0_i32_4 : i32
    scf.if %6 {
      %cst_9 = arith.constant 0.000000e+00 : f32
      %13 = vector.broadcast %cst_9 : f32 to vector<2x24x128xf32>
      %c0_10 = arith.constant 0 : index
      %c0_11 = arith.constant 0 : index
      %c0_12 = arith.constant 0 : index
      %14 = vector.load %arg6[%c0_10, %c0_11, %c0_12] : memref<2x24x128xf32, #tpu.memory_space<vmem>>, vector<2x24x128xf32>
      tpu.vector_store %arg6[%c0_10, %c0_11, %c0_12], %13 {strides = array<i32>} : memref<2x24x128xf32, #tpu.memory_space<vmem>>, vector<2x24x128xf32>,
      %c0_13 = arith.constant 0 : index
      %c3 = arith.constant 3 : index
      %c3_14 = arith.constant 3 : index
      %15 = vector.load %arg6[%c0_13, %c3, %c3_14] : memref<2x24x128xf32, #tpu.memory_space<vmem>>, vector<1x16x16xf32>
      %16 = vector.shape_cast %15 : vector<1x16x16xf32> to vector<16x16xf32>
      %17 = vector.shape_cast %2 : vector<16x16xf32> to vector<1x16x16xf32>
      tpu.vector_store %arg6[%c0_13, %c3, %c3_14], %17 {strides = array<i32>} : memref<2x24x128xf32, #tpu.memory_space<vmem>>, vector<1x16x16xf32>,
      %c1 = arith.constant 1 : index
      %c3_15 = arith.constant 3 : index
      %c3_16 = arith.constant 3 : index
      %18 = vector.load %arg6[%c1, %c3_15, %c3_16] : memref<2x24x128xf32, #tpu.memory_space<vmem>>, vector<1x16x16xf32>
      %19 = vector.shape_cast %18 : vector<1x16x16xf32> to vector<16x16xf32>
      %20 = vector.shape_cast %3 : vector<16x16xf32> to vector<1x16x16xf32>
      tpu.vector_store %arg6[%c1, %c3_15, %c3_16], %20 {strides = array<i32>} : memref<2x24x128xf32, #tpu.memory_space<vmem>>, vector<1x16x16xf32>,
    } else {
    }
    %c0_i32_5 = arith.constant 0 : i32
    %7 = arith.cmpi sgt, %arg1, %c0_i32_5 : i32
    %8 = arith.extui %7 : i1 to i32
    %c0_i32_6 = arith.constant 0 : i32
    %9 = arith.cmpi ne, %8, %c0_i32_6 : i32
    scf.if %9 {
      %c0_9 = arith.constant 0 : index
      %c3 = arith.constant 3 : index
      %c3_10 = arith.constant 3 : index
      %13 = vector.load %arg6[%c0_9, %c3, %c3_10] : memref<2x24x128xf32, #tpu.memory_space<vmem>>, vector<1x16x16xf32>
      %14 = vector.shape_cast %13 : vector<1x16x16xf32> to vector<16x16xf32>
      %15 = arith.addf %14, %2 : vector<16x16xf32>
      %c0_11 = arith.constant 0 : index
      %c3_12 = arith.constant 3 : index
      %c3_13 = arith.constant 3 : index
      %16 = vector.load %arg6[%c0_11, %c3_12, %c3_13] : memref<2x24x128xf32, #tpu.memory_space<vmem>>, vector<1x16x16xf32>
      %17 = vector.shape_cast %16 : vector<1x16x16xf32> to vector<16x16xf32>
      %18 = vector.shape_cast %15 : vector<16x16xf32> to vector<1x16x16xf32>
      tpu.vector_store %arg6[%c0_11, %c3_12, %c3_13], %18 {strides = array<i32>} : memref<2x24x128xf32, #tpu.memory_space<vmem>>, vector<1x16x16xf32>,
      %c1 = arith.constant 1 : index
      %c3_14 = arith.constant 3 : index
      %c3_15 = arith.constant 3 : index
      %19 = vector.load %arg6[%c1, %c3_14, %c3_15] : memref<2x24x128xf32, #tpu.memory_space<vmem>>, vector<1x16x16xf32>
      %20 = vector.shape_cast %19 : vector<1x16x16xf32> to vector<16x16xf32>
      %21 = arith.maximumf %20, %3 : vector<16x16xf32>
      %c1_16 = arith.constant 1 : index
      %c3_17 = arith.constant 3 : index
      %c3_18 = arith.constant 3 : index
      %22 = vector.load %arg6[%c1_16, %c3_17, %c3_18] : memref<2x24x128xf32, #tpu.memory_space<vmem>>, vector<1x16x16xf32>
      %23 = vector.shape_cast %22 : vector<1x16x16xf32> to vector<16x16xf32>
      %24 = vector.shape_cast %21 : vector<16x16xf32> to vector<1x16x16xf32>
      tpu.vector_store %arg6[%c1_16, %c3_17, %c3_18], %24 {strides = array<i32>} : memref<2x24x128xf32, #tpu.memory_space<vmem>>, vector<1x16x16xf32>,
    } else {
    }
    %c0_i32_7 = arith.constant 0 : i32
    %10 = arith.cmpi eq, %arg1, %c0_i32_7 : i32
    %11 = arith.extui %10 : i1 to i32
    %c0_i32_8 = arith.constant 0 : i32
    %12 = arith.cmpi ne, %11, %c0_i32_8 : i32
    scf.if %12 {
      %c0_9 = arith.constant 0 : index
      %13 = memref.load %arg3[%c0_9] : memref<98xf32, #tpu.memory_space<smem>>
      %c1 = arith.constant 1 : index
      %14 = memref.load %arg3[%c1] : memref<98xf32, #tpu.memory_space<smem>>
      %c2 = arith.constant 2 : index
      %15 = memref.load %arg3[%c2] : memref<98xf32, #tpu.memory_space<smem>>
      %c3 = arith.constant 3 : index
      %16 = memref.load %arg3[%c3] : memref<98xf32, #tpu.memory_space<smem>>
      %c4 = arith.constant 4 : index
      %17 = memref.load %arg3[%c4] : memref<98xf32, #tpu.memory_space<smem>>
      %c5 = arith.constant 5 : index
      %18 = memref.load %arg3[%c5] : memref<98xf32, #tpu.memory_space<smem>>
      %c6 = arith.constant 6 : index
      %19 = memref.load %arg3[%c6] : memref<98xf32, #tpu.memory_space<smem>>
      %c7 = arith.constant 7 : index
      %20 = memref.load %arg3[%c7] : memref<98xf32, #tpu.memory_space<smem>>
      %c8 = arith.constant 8 : index
      %21 = memref.load %arg3[%c8] : memref<98xf32, #tpu.memory_space<smem>>
      %c9 = arith.constant 9 : index
      %22 = memref.load %arg3[%c9] : memref<98xf32, #tpu.memory_space<smem>>
      %c10 = arith.constant 10 : index
      %23 = memref.load %arg3[%c10] : memref<98xf32, #tpu.memory_space<smem>>
      %c11 = arith.constant 11 : index
      %24 = memref.load %arg3[%c11] : memref<98xf32, #tpu.memory_space<smem>>
      %c12 = arith.constant 12 : index
      %25 = memref.load %arg3[%c12] : memref<98xf32, #tpu.memory_space<smem>>
      %c13 = arith.constant 13 : index
      %26 = memref.load %arg3[%c13] : memref<98xf32, #tpu.memory_space<smem>>
      %c14 = arith.constant 14 : index
      %27 = memref.load %arg3[%c14] : memref<98xf32, #tpu.memory_space<smem>>
      %c15 = arith.constant 15 : index
      %28 = memref.load %arg3[%c15] : memref<98xf32, #tpu.memory_space<smem>>
      %c16 = arith.constant 16 : index
      %29 = memref.load %arg3[%c16] : memref<98xf32, #tpu.memory_space<smem>>
      %c17 = arith.constant 17 : index
      %30 = memref.load %arg3[%c17] : memref<98xf32, #tpu.memory_space<smem>>
      %c18 = arith.constant 18 : index
      %31 = memref.load %arg3[%c18] : memref<98xf32, #tpu.memory_space<smem>>
      %c19 = arith.constant 19 : index
      %32 = memref.load %arg3[%c19] : memref<98xf32, #tpu.memory_space<smem>>
      %c20 = arith.constant 20 : index
      %33 = memref.load %arg3[%c20] : memref<98xf32, #tpu.memory_space<smem>>
      %c21 = arith.constant 21 : index
      %34 = memref.load %arg3[%c21] : memref<98xf32, #tpu.memory_space<smem>>
      %c22 = arith.constant 22 : index
      %35 = memref.load %arg3[%c22] : memref<98xf32, #tpu.memory_space<smem>>
      %c23 = arith.constant 23 : index
      %36 = memref.load %arg3[%c23] : memref<98xf32, #tpu.memory_space<smem>>
      %c24 = arith.constant 24 : index
      %37 = memref.load %arg3[%c24] : memref<98xf32, #tpu.memory_space<smem>>
      %c25 = arith.constant 25 : index
      %38 = memref.load %arg3[%c25] : memref<98xf32, #tpu.memory_space<smem>>
      %c26 = arith.constant 26 : index
      %39 = memref.load %arg3[%c26] : memref<98xf32, #tpu.memory_space<smem>>
      %c27 = arith.constant 27 : index
      %40 = memref.load %arg3[%c27] : memref<98xf32, #tpu.memory_space<smem>>
      %c28 = arith.constant 28 : index
      %41 = memref.load %arg3[%c28] : memref<98xf32, #tpu.memory_space<smem>>
      %c29 = arith.constant 29 : index
      %42 = memref.load %arg3[%c29] : memref<98xf32, #tpu.memory_space<smem>>
      %c30 = arith.constant 30 : index
      %43 = memref.load %arg3[%c30] : memref<98xf32, #tpu.memory_space<smem>>
      %c31 = arith.constant 31 : index
      %44 = memref.load %arg3[%c31] : memref<98xf32, #tpu.memory_space<smem>>
      %c32 = arith.constant 32 : index
      %45 = memref.load %arg3[%c32] : memref<98xf32, #tpu.memory_space<smem>>
      %c33 = arith.constant 33 : index
      %46 = memref.load %arg3[%c33] : memref<98xf32, #tpu.memory_space<smem>>
      %c34 = arith.constant 34 : index
      %47 = memref.load %arg3[%c34] : memref<98xf32, #tpu.memory_space<smem>>
      %c35 = arith.constant 35 : index
      %48 = memref.load %arg3[%c35] : memref<98xf32, #tpu.memory_space<smem>>
      %c36 = arith.constant 36 : index
      %49 = memref.load %arg3[%c36] : memref<98xf32, #tpu.memory_space<smem>>
      %c37 = arith.constant 37 : index
      %50 = memref.load %arg3[%c37] : memref<98xf32, #tpu.memory_space<smem>>
      %c38 = arith.constant 38 : index
      %51 = memref.load %arg3[%c38] : memref<98xf32, #tpu.memory_space<smem>>
      %c39 = arith.constant 39 : index
      %52 = memref.load %arg3[%c39] : memref<98xf32, #tpu.memory_space<smem>>
      %c40 = arith.constant 40 : index
      %53 = memref.load %arg3[%c40] : memref<98xf32, #tpu.memory_space<smem>>
      %c41 = arith.constant 41 : index
      %54 = memref.load %arg3[%c41] : memref<98xf32, #tpu.memory_space<smem>>
      %c42 = arith.constant 42 : index
      %55 = memref.load %arg3[%c42] : memref<98xf32, #tpu.memory_space<smem>>
      %c43 = arith.constant 43 : index
      %56 = memref.load %arg3[%c43] : memref<98xf32, #tpu.memory_space<smem>>
      %c44 = arith.constant 44 : index
      %57 = memref.load %arg3[%c44] : memref<98xf32, #tpu.memory_space<smem>>
      %c45 = arith.constant 45 : index
      %58 = memref.load %arg3[%c45] : memref<98xf32, #tpu.memory_space<smem>>
      %c46 = arith.constant 46 : index
      %59 = memref.load %arg3[%c46] : memref<98xf32, #tpu.memory_space<smem>>
      %c47 = arith.constant 47 : index
      %60 = memref.load %arg3[%c47] : memref<98xf32, #tpu.memory_space<smem>>
      %c48 = arith.constant 48 : index
      %61 = memref.load %arg3[%c48] : memref<98xf32, #tpu.memory_space<smem>>
      %c49 = arith.constant 49 : index
      %62 = memref.load %arg3[%c49] : memref<98xf32, #tpu.memory_space<smem>>
      %c50 = arith.constant 50 : index
      %63 = memref.load %arg3[%c50] : memref<98xf32, #tpu.memory_space<smem>>
      %c51 = arith.constant 51 : index
      %64 = memref.load %arg3[%c51] : memref<98xf32, #tpu.memory_space<smem>>
      %c52 = arith.constant 52 : index
      %65 = memref.load %arg3[%c52] : memref<98xf32, #tpu.memory_space<smem>>
      %c53 = arith.constant 53 : index
      %66 = memref.load %arg3[%c53] : memref<98xf32, #tpu.memory_space<smem>>
      %c54 = arith.constant 54 : index
      %67 = memref.load %arg3[%c54] : memref<98xf32, #tpu.memory_space<smem>>
      %c55 = arith.constant 55 : index
      %68 = memref.load %arg3[%c55] : memref<98xf32, #tpu.memory_space<smem>>
      %c56 = arith.constant 56 : index
      %69 = memref.load %arg3[%c56] : memref<98xf32, #tpu.memory_space<smem>>
      %c57 = arith.constant 57 : index
      %70 = memref.load %arg3[%c57] : memref<98xf32, #tpu.memory_space<smem>>
      %c58 = arith.constant 58 : index
      %71 = memref.load %arg3[%c58] : memref<98xf32, #tpu.memory_space<smem>>
      %c59 = arith.constant 59 : index
      %72 = memref.load %arg3[%c59] : memref<98xf32, #tpu.memory_space<smem>>
      %c60 = arith.constant 60 : index
      %73 = memref.load %arg3[%c60] : memref<98xf32, #tpu.memory_space<smem>>
      %c61 = arith.constant 61 : index
      %74 = memref.load %arg3[%c61] : memref<98xf32, #tpu.memory_space<smem>>
      %c62 = arith.constant 62 : index
      %75 = memref.load %arg3[%c62] : memref<98xf32, #tpu.memory_space<smem>>
      %c63 = arith.constant 63 : index
      %76 = memref.load %arg3[%c63] : memref<98xf32, #tpu.memory_space<smem>>
      %c64 = arith.constant 64 : index
      %77 = memref.load %arg3[%c64] : memref<98xf32, #tpu.memory_space<smem>>
      %c65 = arith.constant 65 : index
      %78 = memref.load %arg3[%c65] : memref<98xf32, #tpu.memory_space<smem>>
      %c66 = arith.constant 66 : index
      %79 = memref.load %arg3[%c66] : memref<98xf32, #tpu.memory_space<smem>>
      %c67 = arith.constant 67 : index
      %80 = memref.load %arg3[%c67] : memref<98xf32, #tpu.memory_space<smem>>
      %c68 = arith.constant 68 : index
      %81 = memref.load %arg3[%c68] : memref<98xf32, #tpu.memory_space<smem>>
      %c69 = arith.constant 69 : index
      %82 = memref.load %arg3[%c69] : memref<98xf32, #tpu.memory_space<smem>>
      %c70 = arith.constant 70 : index
      %83 = memref.load %arg3[%c70] : memref<98xf32, #tpu.memory_space<smem>>
      %c71 = arith.constant 71 : index
      %84 = memref.load %arg3[%c71] : memref<98xf32, #tpu.memory_space<smem>>
      %c72 = arith.constant 72 : index
      %85 = memref.load %arg3[%c72] : memref<98xf32, #tpu.memory_space<smem>>
      %c73 = arith.constant 73 : index
      %86 = memref.load %arg3[%c73] : memref<98xf32, #tpu.memory_space<smem>>
      %c74 = arith.constant 74 : index
      %87 = memref.load %arg3[%c74] : memref<98xf32, #tpu.memory_space<smem>>
      %c75 = arith.constant 75 : index
      %88 = memref.load %arg3[%c75] : memref<98xf32, #tpu.memory_space<smem>>
      %c76 = arith.constant 76 : index
      %89 = memref.load %arg3[%c76] : memref<98xf32, #tpu.memory_space<smem>>
      %c77 = arith.constant 77 : index
      %90 = memref.load %arg3[%c77] : memref<98xf32, #tpu.memory_space<smem>>
      %c78 = arith.constant 78 : index
      %91 = memref.load %arg3[%c78] : memref<98xf32, #tpu.memory_space<smem>>
      %c79 = arith.constant 79 : index
      %92 = memref.load %arg3[%c79] : memref<98xf32, #tpu.memory_space<smem>>
      %c80 = arith.constant 80 : index
      %93 = memref.load %arg3[%c80] : memref<98xf32, #tpu.memory_space<smem>>
      %c81 = arith.constant 81 : index
      %94 = memref.load %arg3[%c81] : memref<98xf32, #tpu.memory_space<smem>>
      %c82 = arith.constant 82 : index
      %95 = memref.load %arg3[%c82] : memref<98xf32, #tpu.memory_space<smem>>
      %c83 = arith.constant 83 : index
      %96 = memref.load %arg3[%c83] : memref<98xf32, #tpu.memory_space<smem>>
      %c84 = arith.constant 84 : index
      %97 = memref.load %arg3[%c84] : memref<98xf32, #tpu.memory_space<smem>>
      %c85 = arith.constant 85 : index
      %98 = memref.load %arg3[%c85] : memref<98xf32, #tpu.memory_space<smem>>
      %c86 = arith.constant 86 : index
      %99 = memref.load %arg3[%c86] : memref<98xf32, #tpu.memory_space<smem>>
      %c87 = arith.constant 87 : index
      %100 = memref.load %arg3[%c87] : memref<98xf32, #tpu.memory_space<smem>>
      %c88 = arith.constant 88 : index
      %101 = memref.load %arg3[%c88] : memref<98xf32, #tpu.memory_space<smem>>
      %c89 = arith.constant 89 : index
      %102 = memref.load %arg3[%c89] : memref<98xf32, #tpu.memory_space<smem>>
      %c90 = arith.constant 90 : index
      %103 = memref.load %arg3[%c90] : memref<98xf32, #tpu.memory_space<smem>>
      %c91 = arith.constant 91 : index
      %104 = memref.load %arg3[%c91] : memref<98xf32, #tpu.memory_space<smem>>
      %c92 = arith.constant 92 : index
      %105 = memref.load %arg3[%c92] : memref<98xf32, #tpu.memory_space<smem>>
      %c93 = arith.constant 93 : index
      %106 = memref.load %arg3[%c93] : memref<98xf32, #tpu.memory_space<smem>>
      %c94 = arith.constant 94 : index
      %107 = memref.load %arg3[%c94] : memref<98xf32, #tpu.memory_space<smem>>
      %c95 = arith.constant 95 : index
      %108 = memref.load %arg3[%c95] : memref<98xf32, #tpu.memory_space<smem>>
      %c96 = arith.constant 96 : index
      %109 = memref.load %arg3[%c96] : memref<98xf32, #tpu.memory_space<smem>>
      %c97 = arith.constant 97 : index
      %110 = memref.load %arg3[%c97] : memref<98xf32, #tpu.memory_space<smem>>
      %c0_10 = arith.constant 0 : index
      %111 = memref.load %arg4[%c0_10] : memref<1xf32, #tpu.memory_space<smem>>
      %c0_11 = arith.constant 0 : index
      %c0_12 = arith.constant 0 : index
      %c0_13 = arith.constant 0 : index
      %112 = vector.load %arg6[%c0_11, %c0_12, %c0_13] : memref<2x24x128xf32, #tpu.memory_space<vmem>>, vector<1x24x128xf32>
      %113 = vector.shape_cast %112 : vector<1x24x128xf32> to vector<24x128xf32>
      %cst_14 = arith.constant 2.500000e-01 : f32
      %114 = vector.broadcast %cst_14 : f32 to vector<24x128xf32>
      %115 = arith.mulf %113, %114 : vector<24x128xf32>
      %c1_15 = arith.constant 1 : index
      %c0_16 = arith.constant 0 : index
      %c0_17 = arith.constant 0 : index
      %116 = vector.load %arg6[%c1_15, %c0_16, %c0_17] : memref<2x24x128xf32, #tpu.memory_space<vmem>>, vector<1x24x128xf32>
      %117 = vector.shape_cast %116 : vector<1x24x128xf32> to vector<24x128xf32>
      %118 = vector.broadcast %111 : f32 to vector<16x128xf32>
      %cst_18 = arith.constant 0.000000e+00 : f32
      %119 = vector.broadcast %cst_18 : f32 to vector<16x128xf32>
      %cst_19 = arith.constant 0.000000e+00 : f32
      %120 = vector.broadcast %cst_19 : f32 to vector<16x128xf32>
      %cst_20 = arith.constant 0.000000e+00 : f32
      %121 = vector.broadcast %cst_20 : f32 to vector<16x128xf32>
      %122 = vector.extract_strided_slice %115 {offsets = [0, 0], sizes = [16, 128], strides = [1, 1]} : vector<24x128xf32> to vector<16x128xf32>
      %123 = vector.broadcast %13 : f32 to vector<16x128xf32>
      %124 = arith.mulf %123, %122 : vector<16x128xf32>
      %125 = arith.addf %118, %124 : vector<16x128xf32>
      %c127_i32 = arith.constant 127 : i32
      %126 = tpu.dynamic_rotate %122 by %c127_i32 dim 1 : vector<16x128xf32>, i32 -> vector<16x128xf32>
      %127 = vector.broadcast %14 : f32 to vector<16x128xf32>
      %128 = arith.mulf %127, %126 : vector<16x128xf32>
      %129 = arith.addf %119, %128 : vector<16x128xf32>
      %c126_i32 = arith.constant 126 : i32
      %130 = tpu.dynamic_rotate %122 by %c126_i32 dim 1 : vector<16x128xf32>, i32 -> vector<16x128xf32>
      %131 = vector.broadcast %15 : f32 to vector<16x128xf32>
      %132 = arith.mulf %131, %130 : vector<16x128xf32>
      %133 = arith.addf %120, %132 : vector<16x128xf32>
      %c125_i32 = arith.constant 125 : i32
      %134 = tpu.dynamic_rotate %122 by %c125_i32 dim 1 : vector<16x128xf32>, i32 -> vector<16x128xf32>
      %135 = vector.broadcast %16 : f32 to vector<16x128xf32>
      %136 = arith.mulf %135, %134 : vector<16x128xf32>
      %137 = arith.addf %121, %136 : vector<16x128xf32>
      %c124_i32 = arith.constant 124 : i32
      %138 = tpu.dynamic_rotate %122 by %c124_i32 dim 1 : vector<16x128xf32>, i32 -> vector<16x128xf32>
      %139 = vector.broadcast %17 : f32 to vector<16x128xf32>
      %140 = arith.mulf %139, %138 : vector<16x128xf32>
      %141 = arith.addf %125, %140 : vector<16x128xf32>
      %c123_i32 = arith.constant 123 : i32
      %142 = tpu.dynamic_rotate %122 by %c123_i32 dim 1 : vector<16x128xf32>, i32 -> vector<16x128xf32>
      %143 = vector.broadcast %18 : f32 to vector<16x128xf32>
      %144 = arith.mulf %143, %142 : vector<16x128xf32>
      %145 = arith.addf %129, %144 : vector<16x128xf32>
      %c122_i32 = arith.constant 122 : i32
      %146 = tpu.dynamic_rotate %122 by %c122_i32 dim 1 : vector<16x128xf32>, i32 -> vector<16x128xf32>
      %147 = vector.broadcast %19 : f32 to vector<16x128xf32>
      %148 = arith.mulf %147, %146 : vector<16x128xf32>
      %149 = arith.addf %133, %148 : vector<16x128xf32>
      %150 = vector.extract_strided_slice %115 {offsets = [1, 0], sizes = [16, 128], strides = [1, 1]} : vector<24x128xf32> to vector<16x128xf32>
      %151 = vector.broadcast %20 : f32 to vector<16x128xf32>
      %152 = arith.mulf %151, %150 : vector<16x128xf32>
      %153 = arith.addf %137, %152 : vector<16x128xf32>
      %c127_i32_21 = arith.constant 127 : i32
      %154 = tpu.dynamic_rotate %150 by %c127_i32_21 dim 1 : vector<16x128xf32>, i32 -> vector<16x128xf32>
      %155 = vector.broadcast %21 : f32 to vector<16x128xf32>
      %156 = arith.mulf %155, %154 : vector<16x128xf32>
      %157 = arith.addf %141, %156 : vector<16x128xf32>
      %c126_i32_22 = arith.constant 126 : i32
      %158 = tpu.dynamic_rotate %150 by %c126_i32_22 dim 1 : vector<16x128xf32>, i32 -> vector<16x128xf32>
      %159 = vector.broadcast %22 : f32 to vector<16x128xf32>
      %160 = arith.mulf %159, %158 : vector<16x128xf32>
      %161 = arith.addf %145, %160 : vector<16x128xf32>
      %c125_i32_23 = arith.constant 125 : i32
      %162 = tpu.dynamic_rotate %150 by %c125_i32_23 dim 1 : vector<16x128xf32>, i32 -> vector<16x128xf32>
      %163 = vector.broadcast %23 : f32 to vector<16x128xf32>
      %164 = arith.mulf %163, %162 : vector<16x128xf32>
      %165 = arith.addf %149, %164 : vector<16x128xf32>
      %c124_i32_24 = arith.constant 124 : i32
      %166 = tpu.dynamic_rotate %150 by %c124_i32_24 dim 1 : vector<16x128xf32>, i32 -> vector<16x128xf32>
      %167 = vector.broadcast %24 : f32 to vector<16x128xf32>
      %168 = arith.mulf %167, %166 : vector<16x128xf32>
      %169 = arith.addf %153, %168 : vector<16x128xf32>
      %c123_i32_25 = arith.constant 123 : i32
      %170 = tpu.dynamic_rotate %150 by %c123_i32_25 dim 1 : vector<16x128xf32>, i32 -> vector<16x128xf32>
      %171 = vector.broadcast %25 : f32 to vector<16x128xf32>
      %172 = arith.mulf %171, %170 : vector<16x128xf32>
      %173 = arith.addf %157, %172 : vector<16x128xf32>
      %c122_i32_26 = arith.constant 122 : i32
      %174 = tpu.dynamic_rotate %150 by %c122_i32_26 dim 1 : vector<16x128xf32>, i32 -> vector<16x128xf32>
      %175 = vector.broadcast %26 : f32 to vector<16x128xf32>
      %176 = arith.mulf %175, %174 : vector<16x128xf32>
      %177 = arith.addf %161, %176 : vector<16x128xf32>
      %178 = vector.extract_strided_slice %115 {offsets = [2, 0], sizes = [16, 128], strides = [1, 1]} : vector<24x128xf32> to vector<16x128xf32>
      %179 = vector.broadcast %27 : f32 to vector<16x128xf32>
      %180 = arith.mulf %179, %178 : vector<16x128xf32>
      %181 = arith.addf %165, %180 : vector<16x128xf32>
      %c127_i32_27 = arith.constant 127 : i32
      %182 = tpu.dynamic_rotate %178 by %c127_i32_27 dim 1 : vector<16x128xf32>, i32 -> vector<16x128xf32>
      %183 = vector.broadcast %28 : f32 to vector<16x128xf32>
      %184 = arith.mulf %183, %182 : vector<16x128xf32>
      %185 = arith.addf %169, %184 : vector<16x128xf32>
      %c126_i32_28 = arith.constant 126 : i32
      %186 = tpu.dynamic_rotate %178 by %c126_i32_28 dim 1 : vector<16x128xf32>, i32 -> vector<16x128xf32>
      %187 = vector.broadcast %29 : f32 to vector<16x128xf32>
      %188 = arith.mulf %187, %186 : vector<16x128xf32>
      %189 = arith.addf %173, %188 : vector<16x128xf32>
      %c125_i32_29 = arith.constant 125 : i32
      %190 = tpu.dynamic_rotate %178 by %c125_i32_29 dim 1 : vector<16x128xf32>, i32 -> vector<16x128xf32>
      %191 = vector.broadcast %30 : f32 to vector<16x128xf32>
      %192 = arith.mulf %191, %190 : vector<16x128xf32>
      %193 = arith.addf %177, %192 : vector<16x128xf32>
      %c124_i32_30 = arith.constant 124 : i32
      %194 = tpu.dynamic_rotate %178 by %c124_i32_30 dim 1 : vector<16x128xf32>, i32 -> vector<16x128xf32>
      %195 = vector.broadcast %31 : f32 to vector<16x128xf32>
      %196 = arith.mulf %195, %194 : vector<16x128xf32>
      %197 = arith.addf %181, %196 : vector<16x128xf32>
      %c123_i32_31 = arith.constant 123 : i32
      %198 = tpu.dynamic_rotate %178 by %c123_i32_31 dim 1 : vector<16x128xf32>, i32 -> vector<16x128xf32>
      %199 = vector.broadcast %32 : f32 to vector<16x128xf32>
      %200 = arith.mulf %199, %198 : vector<16x128xf32>
      %201 = arith.addf %185, %200 : vector<16x128xf32>
      %c122_i32_32 = arith.constant 122 : i32
      %202 = tpu.dynamic_rotate %178 by %c122_i32_32 dim 1 : vector<16x128xf32>, i32 -> vector<16x128xf32>
      %203 = vector.broadcast %33 : f32 to vector<16x128xf32>
      %204 = arith.mulf %203, %202 : vector<16x128xf32>
      %205 = arith.addf %189, %204 : vector<16x128xf32>
      %206 = vector.extract_strided_slice %115 {offsets = [3, 0], sizes = [16, 128], strides = [1, 1]} : vector<24x128xf32> to vector<16x128xf32>
      %207 = vector.broadcast %34 : f32 to vector<16x128xf32>
      %208 = arith.mulf %207, %206 : vector<16x128xf32>
      %209 = arith.addf %193, %208 : vector<16x128xf32>
      %c127_i32_33 = arith.constant 127 : i32
      %210 = tpu.dynamic_rotate %206 by %c127_i32_33 dim 1 : vector<16x128xf32>, i32 -> vector<16x128xf32>
      %211 = vector.broadcast %35 : f32 to vector<16x128xf32>
      %212 = arith.mulf %211, %210 : vector<16x128xf32>
      %213 = arith.addf %197, %212 : vector<16x128xf32>
      %c126_i32_34 = arith.constant 126 : i32
      %214 = tpu.dynamic_rotate %206 by %c126_i32_34 dim 1 : vector<16x128xf32>, i32 -> vector<16x128xf32>
      %215 = vector.broadcast %36 : f32 to vector<16x128xf32>
      %216 = arith.mulf %215, %214 : vector<16x128xf32>
      %217 = arith.addf %201, %216 : vector<16x128xf32>
      %c125_i32_35 = arith.constant 125 : i32
      %218 = tpu.dynamic_rotate %206 by %c125_i32_35 dim 1 : vector<16x128xf32>, i32 -> vector<16x128xf32>
      %219 = vector.broadcast %37 : f32 to vector<16x128xf32>
      %220 = arith.mulf %219, %218 : vector<16x128xf32>
      %221 = arith.addf %205, %220 : vector<16x128xf32>
      %c124_i32_36 = arith.constant 124 : i32
      %222 = tpu.dynamic_rotate %206 by %c124_i32_36 dim 1 : vector<16x128xf32>, i32 -> vector<16x128xf32>
      %223 = vector.broadcast %38 : f32 to vector<16x128xf32>
      %224 = arith.mulf %223, %222 : vector<16x128xf32>
      %225 = arith.addf %209, %224 : vector<16x128xf32>
      %c123_i32_37 = arith.constant 123 : i32
      %226 = tpu.dynamic_rotate %206 by %c123_i32_37 dim 1 : vector<16x128xf32>, i32 -> vector<16x128xf32>
      %227 = vector.broadcast %39 : f32 to vector<16x128xf32>
      %228 = arith.mulf %227, %226 : vector<16x128xf32>
      %229 = arith.addf %213, %228 : vector<16x128xf32>
      %c122_i32_38 = arith.constant 122 : i32
      %230 = tpu.dynamic_rotate %206 by %c122_i32_38 dim 1 : vector<16x128xf32>, i32 -> vector<16x128xf32>
      %231 = vector.broadcast %40 : f32 to vector<16x128xf32>
      %232 = arith.mulf %231, %230 : vector<16x128xf32>
      %233 = arith.addf %217, %232 : vector<16x128xf32>
      %234 = vector.extract_strided_slice %115 {offsets = [4, 0], sizes = [16, 128], strides = [1, 1]} : vector<24x128xf32> to vector<16x128xf32>
      %235 = vector.broadcast %41 : f32 to vector<16x128xf32>
      %236 = arith.mulf %235, %234 : vector<16x128xf32>
      %237 = arith.addf %221, %236 : vector<16x128xf32>
      %c127_i32_39 = arith.constant 127 : i32
      %238 = tpu.dynamic_rotate %234 by %c127_i32_39 dim 1 : vector<16x128xf32>, i32 -> vector<16x128xf32>
      %239 = vector.broadcast %42 : f32 to vector<16x128xf32>
      %240 = arith.mulf %239, %238 : vector<16x128xf32>
      %241 = arith.addf %225, %240 : vector<16x128xf32>
      %c126_i32_40 = arith.constant 126 : i32
      %242 = tpu.dynamic_rotate %234 by %c126_i32_40 dim 1 : vector<16x128xf32>, i32 -> vector<16x128xf32>
      %243 = vector.broadcast %43 : f32 to vector<16x128xf32>
      %244 = arith.mulf %243, %242 : vector<16x128xf32>
      %245 = arith.addf %229, %244 : vector<16x128xf32>
      %c125_i32_41 = arith.constant 125 : i32
      %246 = tpu.dynamic_rotate %234 by %c125_i32_41 dim 1 : vector<16x128xf32>, i32 -> vector<16x128xf32>
      %247 = vector.broadcast %44 : f32 to vector<16x128xf32>
      %248 = arith.mulf %247, %246 : vector<16x128xf32>
      %249 = arith.addf %233, %248 : vector<16x128xf32>
      %c124_i32_42 = arith.constant 124 : i32
      %250 = tpu.dynamic_rotate %234 by %c124_i32_42 dim 1 : vector<16x128xf32>, i32 -> vector<16x128xf32>
      %251 = vector.broadcast %45 : f32 to vector<16x128xf32>
      %252 = arith.mulf %251, %250 : vector<16x128xf32>
      %253 = arith.addf %237, %252 : vector<16x128xf32>
      %c123_i32_43 = arith.constant 123 : i32
      %254 = tpu.dynamic_rotate %234 by %c123_i32_43 dim 1 : vector<16x128xf32>, i32 -> vector<16x128xf32>
      %255 = vector.broadcast %46 : f32 to vector<16x128xf32>
      %256 = arith.mulf %255, %254 : vector<16x128xf32>
      %257 = arith.addf %241, %256 : vector<16x128xf32>
      %c122_i32_44 = arith.constant 122 : i32
      %258 = tpu.dynamic_rotate %234 by %c122_i32_44 dim 1 : vector<16x128xf32>, i32 -> vector<16x128xf32>
      %259 = vector.broadcast %47 : f32 to vector<16x128xf32>
      %260 = arith.mulf %259, %258 : vector<16x128xf32>
      %261 = arith.addf %245, %260 : vector<16x128xf32>
      %262 = vector.extract_strided_slice %115 {offsets = [5, 0], sizes = [16, 128], strides = [1, 1]} : vector<24x128xf32> to vector<16x128xf32>
      %263 = vector.broadcast %48 : f32 to vector<16x128xf32>
      %264 = arith.mulf %263, %262 : vector<16x128xf32>
      %265 = arith.addf %249, %264 : vector<16x128xf32>
      %c127_i32_45 = arith.constant 127 : i32
      %266 = tpu.dynamic_rotate %262 by %c127_i32_45 dim 1 : vector<16x128xf32>, i32 -> vector<16x128xf32>
      %267 = vector.broadcast %49 : f32 to vector<16x128xf32>
      %268 = arith.mulf %267, %266 : vector<16x128xf32>
      %269 = arith.addf %253, %268 : vector<16x128xf32>
      %c126_i32_46 = arith.constant 126 : i32
      %270 = tpu.dynamic_rotate %262 by %c126_i32_46 dim 1 : vector<16x128xf32>, i32 -> vector<16x128xf32>
      %271 = vector.broadcast %50 : f32 to vector<16x128xf32>
      %272 = arith.mulf %271, %270 : vector<16x128xf32>
      %273 = arith.addf %257, %272 : vector<16x128xf32>
      %c125_i32_47 = arith.constant 125 : i32
      %274 = tpu.dynamic_rotate %262 by %c125_i32_47 dim 1 : vector<16x128xf32>, i32 -> vector<16x128xf32>
      %275 = vector.broadcast %51 : f32 to vector<16x128xf32>
      %276 = arith.mulf %275, %274 : vector<16x128xf32>
      %277 = arith.addf %261, %276 : vector<16x128xf32>
      %c124_i32_48 = arith.constant 124 : i32
      %278 = tpu.dynamic_rotate %262 by %c124_i32_48 dim 1 : vector<16x128xf32>, i32 -> vector<16x128xf32>
      %279 = vector.broadcast %52 : f32 to vector<16x128xf32>
      %280 = arith.mulf %279, %278 : vector<16x128xf32>
      %281 = arith.addf %265, %280 : vector<16x128xf32>
      %c123_i32_49 = arith.constant 123 : i32
      %282 = tpu.dynamic_rotate %262 by %c123_i32_49 dim 1 : vector<16x128xf32>, i32 -> vector<16x128xf32>
      %283 = vector.broadcast %53 : f32 to vector<16x128xf32>
      %284 = arith.mulf %283, %282 : vector<16x128xf32>
      %285 = arith.addf %269, %284 : vector<16x128xf32>
      %c122_i32_50 = arith.constant 122 : i32
      %286 = tpu.dynamic_rotate %262 by %c122_i32_50 dim 1 : vector<16x128xf32>, i32 -> vector<16x128xf32>
      %287 = vector.broadcast %54 : f32 to vector<16x128xf32>
      %288 = arith.mulf %287, %286 : vector<16x128xf32>
      %289 = arith.addf %273, %288 : vector<16x128xf32>
      %290 = vector.extract_strided_slice %115 {offsets = [6, 0], sizes = [16, 128], strides = [1, 1]} : vector<24x128xf32> to vector<16x128xf32>
      %291 = vector.broadcast %55 : f32 to vector<16x128xf32>
      %292 = arith.mulf %291, %290 : vector<16x128xf32>
      %293 = arith.addf %277, %292 : vector<16x128xf32>
      %c127_i32_51 = arith.constant 127 : i32
      %294 = tpu.dynamic_rotate %290 by %c127_i32_51 dim 1 : vector<16x128xf32>, i32 -> vector<16x128xf32>
      %295 = vector.broadcast %56 : f32 to vector<16x128xf32>
      %296 = arith.mulf %295, %294 : vector<16x128xf32>
      %297 = arith.addf %281, %296 : vector<16x128xf32>
      %c126_i32_52 = arith.constant 126 : i32
      %298 = tpu.dynamic_rotate %290 by %c126_i32_52 dim 1 : vector<16x128xf32>, i32 -> vector<16x128xf32>
      %299 = vector.broadcast %57 : f32 to vector<16x128xf32>
      %300 = arith.mulf %299, %298 : vector<16x128xf32>
      %301 = arith.addf %285, %300 : vector<16x128xf32>
      %c125_i32_53 = arith.constant 125 : i32
      %302 = tpu.dynamic_rotate %290 by %c125_i32_53 dim 1 : vector<16x128xf32>, i32 -> vector<16x128xf32>
      %303 = vector.broadcast %58 : f32 to vector<16x128xf32>
      %304 = arith.mulf %303, %302 : vector<16x128xf32>
      %305 = arith.addf %289, %304 : vector<16x128xf32>
      %c124_i32_54 = arith.constant 124 : i32
      %306 = tpu.dynamic_rotate %290 by %c124_i32_54 dim 1 : vector<16x128xf32>, i32 -> vector<16x128xf32>
      %307 = vector.broadcast %59 : f32 to vector<16x128xf32>
      %308 = arith.mulf %307, %306 : vector<16x128xf32>
      %309 = arith.addf %293, %308 : vector<16x128xf32>
      %c123_i32_55 = arith.constant 123 : i32
      %310 = tpu.dynamic_rotate %290 by %c123_i32_55 dim 1 : vector<16x128xf32>, i32 -> vector<16x128xf32>
      %311 = vector.broadcast %60 : f32 to vector<16x128xf32>
      %312 = arith.mulf %311, %310 : vector<16x128xf32>
      %313 = arith.addf %297, %312 : vector<16x128xf32>
      %c122_i32_56 = arith.constant 122 : i32
      %314 = tpu.dynamic_rotate %290 by %c122_i32_56 dim 1 : vector<16x128xf32>, i32 -> vector<16x128xf32>
      %315 = vector.broadcast %61 : f32 to vector<16x128xf32>
      %316 = arith.mulf %315, %314 : vector<16x128xf32>
      %317 = arith.addf %301, %316 : vector<16x128xf32>
      %318 = vector.extract_strided_slice %117 {offsets = [0, 0], sizes = [16, 128], strides = [1, 1]} : vector<24x128xf32> to vector<16x128xf32>
      %319 = vector.broadcast %62 : f32 to vector<16x128xf32>
      %320 = arith.mulf %319, %318 : vector<16x128xf32>
      %321 = arith.addf %305, %320 : vector<16x128xf32>
      %c127_i32_57 = arith.constant 127 : i32
      %322 = tpu.dynamic_rotate %318 by %c127_i32_57 dim 1 : vector<16x128xf32>, i32 -> vector<16x128xf32>
      %323 = vector.broadcast %63 : f32 to vector<16x128xf32>
      %324 = arith.mulf %323, %322 : vector<16x128xf32>
      %325 = arith.addf %309, %324 : vector<16x128xf32>
      %c126_i32_58 = arith.constant 126 : i32
      %326 = tpu.dynamic_rotate %318 by %c126_i32_58 dim 1 : vector<16x128xf32>, i32 -> vector<16x128xf32>
      %327 = vector.broadcast %64 : f32 to vector<16x128xf32>
      %328 = arith.mulf %327, %326 : vector<16x128xf32>
      %329 = arith.addf %313, %328 : vector<16x128xf32>
      %c125_i32_59 = arith.constant 125 : i32
      %330 = tpu.dynamic_rotate %318 by %c125_i32_59 dim 1 : vector<16x128xf32>, i32 -> vector<16x128xf32>
      %331 = vector.broadcast %65 : f32 to vector<16x128xf32>
      %332 = arith.mulf %331, %330 : vector<16x128xf32>
      %333 = arith.addf %317, %332 : vector<16x128xf32>
      %c124_i32_60 = arith.constant 124 : i32
      %334 = tpu.dynamic_rotate %318 by %c124_i32_60 dim 1 : vector<16x128xf32>, i32 -> vector<16x128xf32>
      %335 = vector.broadcast %66 : f32 to vector<16x128xf32>
      %336 = arith.mulf %335, %334 : vector<16x128xf32>
      %337 = arith.addf %321, %336 : vector<16x128xf32>
      %c123_i32_61 = arith.constant 123 : i32
      %338 = tpu.dynamic_rotate %318 by %c123_i32_61 dim 1 : vector<16x128xf32>, i32 -> vector<16x128xf32>
      %339 = vector.broadcast %67 : f32 to vector<16x128xf32>
      %340 = arith.mulf %339, %338 : vector<16x128xf32>
      %341 = arith.addf %325, %340 : vector<16x128xf32>
      %c122_i32_62 = arith.constant 122 : i32
      %342 = tpu.dynamic_rotate %318 by %c122_i32_62 dim 1 : vector<16x128xf32>, i32 -> vector<16x128xf32>
      %343 = vector.broadcast %68 : f32 to vector<16x128xf32>
      %344 = arith.mulf %343, %342 : vector<16x128xf32>
      %345 = arith.addf %329, %344 : vector<16x128xf32>
      %346 = vector.extract_strided_slice %117 {offsets = [1, 0], sizes = [16, 128], strides = [1, 1]} : vector<24x128xf32> to vector<16x128xf32>
      %347 = vector.broadcast %69 : f32 to vector<16x128xf32>
      %348 = arith.mulf %347, %346 : vector<16x128xf32>
      %349 = arith.addf %333, %348 : vector<16x128xf32>
      %c127_i32_63 = arith.constant 127 : i32
      %350 = tpu.dynamic_rotate %346 by %c127_i32_63 dim 1 : vector<16x128xf32>, i32 -> vector<16x128xf32>
      %351 = vector.broadcast %70 : f32 to vector<16x128xf32>
      %352 = arith.mulf %351, %350 : vector<16x128xf32>
      %353 = arith.addf %337, %352 : vector<16x128xf32>
      %c126_i32_64 = arith.constant 126 : i32
      %354 = tpu.dynamic_rotate %346 by %c126_i32_64 dim 1 : vector<16x128xf32>, i32 -> vector<16x128xf32>
      %355 = vector.broadcast %71 : f32 to vector<16x128xf32>
      %356 = arith.mulf %355, %354 : vector<16x128xf32>
      %357 = arith.addf %341, %356 : vector<16x128xf32>
      %c125_i32_65 = arith.constant 125 : i32
      %358 = tpu.dynamic_rotate %346 by %c125_i32_65 dim 1 : vector<16x128xf32>, i32 -> vector<16x128xf32>
      %359 = vector.broadcast %72 : f32 to vector<16x128xf32>
      %360 = arith.mulf %359, %358 : vector<16x128xf32>
      %361 = arith.addf %345, %360 : vector<16x128xf32>
      %c124_i32_66 = arith.constant 124 : i32
      %362 = tpu.dynamic_rotate %346 by %c124_i32_66 dim 1 : vector<16x128xf32>, i32 -> vector<16x128xf32>
      %363 = vector.broadcast %73 : f32 to vector<16x128xf32>
      %364 = arith.mulf %363, %362 : vector<16x128xf32>
      %365 = arith.addf %349, %364 : vector<16x128xf32>
      %c123_i32_67 = arith.constant 123 : i32
      %366 = tpu.dynamic_rotate %346 by %c123_i32_67 dim 1 : vector<16x128xf32>, i32 -> vector<16x128xf32>
      %367 = vector.broadcast %74 : f32 to vector<16x128xf32>
      %368 = arith.mulf %367, %366 : vector<16x128xf32>
      %369 = arith.addf %353, %368 : vector<16x128xf32>
      %c122_i32_68 = arith.constant 122 : i32
      %370 = tpu.dynamic_rotate %346 by %c122_i32_68 dim 1 : vector<16x128xf32>, i32 -> vector<16x128xf32>
      %371 = vector.broadcast %75 : f32 to vector<16x128xf32>
      %372 = arith.mulf %371, %370 : vector<16x128xf32>
      %373 = arith.addf %357, %372 : vector<16x128xf32>
      %374 = vector.extract_strided_slice %117 {offsets = [2, 0], sizes = [16, 128], strides = [1, 1]} : vector<24x128xf32> to vector<16x128xf32>
      %375 = vector.broadcast %76 : f32 to vector<16x128xf32>
      %376 = arith.mulf %375, %374 : vector<16x128xf32>
      %377 = arith.addf %361, %376 : vector<16x128xf32>
      %c127_i32_69 = arith.constant 127 : i32
      %378 = tpu.dynamic_rotate %374 by %c127_i32_69 dim 1 : vector<16x128xf32>, i32 -> vector<16x128xf32>
      %379 = vector.broadcast %77 : f32 to vector<16x128xf32>
      %380 = arith.mulf %379, %378 : vector<16x128xf32>
      %381 = arith.addf %365, %380 : vector<16x128xf32>
      %c126_i32_70 = arith.constant 126 : i32
      %382 = tpu.dynamic_rotate %374 by %c126_i32_70 dim 1 : vector<16x128xf32>, i32 -> vector<16x128xf32>
      %383 = vector.broadcast %78 : f32 to vector<16x128xf32>
      %384 = arith.mulf %383, %382 : vector<16x128xf32>
      %385 = arith.addf %369, %384 : vector<16x128xf32>
      %c125_i32_71 = arith.constant 125 : i32
      %386 = tpu.dynamic_rotate %374 by %c125_i32_71 dim 1 : vector<16x128xf32>, i32 -> vector<16x128xf32>
      %387 = vector.broadcast %79 : f32 to vector<16x128xf32>
      %388 = arith.mulf %387, %386 : vector<16x128xf32>
      %389 = arith.addf %373, %388 : vector<16x128xf32>
      %c124_i32_72 = arith.constant 124 : i32
      %390 = tpu.dynamic_rotate %374 by %c124_i32_72 dim 1 : vector<16x128xf32>, i32 -> vector<16x128xf32>
      %391 = vector.broadcast %80 : f32 to vector<16x128xf32>
      %392 = arith.mulf %391, %390 : vector<16x128xf32>
      %393 = arith.addf %377, %392 : vector<16x128xf32>
      %c123_i32_73 = arith.constant 123 : i32
      %394 = tpu.dynamic_rotate %374 by %c123_i32_73 dim 1 : vector<16x128xf32>, i32 -> vector<16x128xf32>
      %395 = vector.broadcast %81 : f32 to vector<16x128xf32>
      %396 = arith.mulf %395, %394 : vector<16x128xf32>
      %397 = arith.addf %381, %396 : vector<16x128xf32>
      %c122_i32_74 = arith.constant 122 : i32
      %398 = tpu.dynamic_rotate %374 by %c122_i32_74 dim 1 : vector<16x128xf32>, i32 -> vector<16x128xf32>
      %399 = vector.broadcast %82 : f32 to vector<16x128xf32>
      %400 = arith.mulf %399, %398 : vector<16x128xf32>
      %401 = arith.addf %385, %400 : vector<16x128xf32>
      %402 = vector.extract_strided_slice %117 {offsets = [3, 0], sizes = [16, 128], strides = [1, 1]} : vector<24x128xf32> to vector<16x128xf32>
      %403 = vector.broadcast %83 : f32 to vector<16x128xf32>
      %404 = arith.mulf %403, %402 : vector<16x128xf32>
      %405 = arith.addf %389, %404 : vector<16x128xf32>
      %c127_i32_75 = arith.constant 127 : i32
      %406 = tpu.dynamic_rotate %402 by %c127_i32_75 dim 1 : vector<16x128xf32>, i32 -> vector<16x128xf32>
      %407 = vector.broadcast %84 : f32 to vector<16x128xf32>
      %408 = arith.mulf %407, %406 : vector<16x128xf32>
      %409 = arith.addf %393, %408 : vector<16x128xf32>
      %c126_i32_76 = arith.constant 126 : i32
      %410 = tpu.dynamic_rotate %402 by %c126_i32_76 dim 1 : vector<16x128xf32>, i32 -> vector<16x128xf32>
      %411 = vector.broadcast %85 : f32 to vector<16x128xf32>
      %412 = arith.mulf %411, %410 : vector<16x128xf32>
      %413 = arith.addf %397, %412 : vector<16x128xf32>
      %c125_i32_77 = arith.constant 125 : i32
      %414 = tpu.dynamic_rotate %402 by %c125_i32_77 dim 1 : vector<16x128xf32>, i32 -> vector<16x128xf32>
      %415 = vector.broadcast %86 : f32 to vector<16x128xf32>
      %416 = arith.mulf %415, %414 : vector<16x128xf32>
      %417 = arith.addf %401, %416 : vector<16x128xf32>
      %c124_i32_78 = arith.constant 124 : i32
      %418 = tpu.dynamic_rotate %402 by %c124_i32_78 dim 1 : vector<16x128xf32>, i32 -> vector<16x128xf32>
      %419 = vector.broadcast %87 : f32 to vector<16x128xf32>
      %420 = arith.mulf %419, %418 : vector<16x128xf32>
      %421 = arith.addf %405, %420 : vector<16x128xf32>
      %c123_i32_79 = arith.constant 123 : i32
      %422 = tpu.dynamic_rotate %402 by %c123_i32_79 dim 1 : vector<16x128xf32>, i32 -> vector<16x128xf32>
      %423 = vector.broadcast %88 : f32 to vector<16x128xf32>
      %424 = arith.mulf %423, %422 : vector<16x128xf32>
      %425 = arith.addf %409, %424 : vector<16x128xf32>
      %c122_i32_80 = arith.constant 122 : i32
      %426 = tpu.dynamic_rotate %402 by %c122_i32_80 dim 1 : vector<16x128xf32>, i32 -> vector<16x128xf32>
      %427 = vector.broadcast %89 : f32 to vector<16x128xf32>
      %428 = arith.mulf %427, %426 : vector<16x128xf32>
      %429 = arith.addf %413, %428 : vector<16x128xf32>
      %430 = vector.extract_strided_slice %117 {offsets = [4, 0], sizes = [16, 128], strides = [1, 1]} : vector<24x128xf32> to vector<16x128xf32>
      %431 = vector.broadcast %90 : f32 to vector<16x128xf32>
      %432 = arith.mulf %431, %430 : vector<16x128xf32>
      %433 = arith.addf %417, %432 : vector<16x128xf32>
      %c127_i32_81 = arith.constant 127 : i32
      %434 = tpu.dynamic_rotate %430 by %c127_i32_81 dim 1 : vector<16x128xf32>, i32 -> vector<16x128xf32>
      %435 = vector.broadcast %91 : f32 to vector<16x128xf32>
      %436 = arith.mulf %435, %434 : vector<16x128xf32>
      %437 = arith.addf %421, %436 : vector<16x128xf32>
      %c126_i32_82 = arith.constant 126 : i32
      %438 = tpu.dynamic_rotate %430 by %c126_i32_82 dim 1 : vector<16x128xf32>, i32 -> vector<16x128xf32>
      %439 = vector.broadcast %92 : f32 to vector<16x128xf32>
      %440 = arith.mulf %439, %438 : vector<16x128xf32>
      %441 = arith.addf %425, %440 : vector<16x128xf32>
      %c125_i32_83 = arith.constant 125 : i32
      %442 = tpu.dynamic_rotate %430 by %c125_i32_83 dim 1 : vector<16x128xf32>, i32 -> vector<16x128xf32>
      %443 = vector.broadcast %93 : f32 to vector<16x128xf32>
      %444 = arith.mulf %443, %442 : vector<16x128xf32>
      %445 = arith.addf %429, %444 : vector<16x128xf32>
      %c124_i32_84 = arith.constant 124 : i32
      %446 = tpu.dynamic_rotate %430 by %c124_i32_84 dim 1 : vector<16x128xf32>, i32 -> vector<16x128xf32>
      %447 = vector.broadcast %94 : f32 to vector<16x128xf32>
      %448 = arith.mulf %447, %446 : vector<16x128xf32>
      %449 = arith.addf %433, %448 : vector<16x128xf32>
      %c123_i32_85 = arith.constant 123 : i32
      %450 = tpu.dynamic_rotate %430 by %c123_i32_85 dim 1 : vector<16x128xf32>, i32 -> vector<16x128xf32>
      %451 = vector.broadcast %95 : f32 to vector<16x128xf32>
      %452 = arith.mulf %451, %450 : vector<16x128xf32>
      %453 = arith.addf %437, %452 : vector<16x128xf32>
      %c122_i32_86 = arith.constant 122 : i32
      %454 = tpu.dynamic_rotate %430 by %c122_i32_86 dim 1 : vector<16x128xf32>, i32 -> vector<16x128xf32>
      %455 = vector.broadcast %96 : f32 to vector<16x128xf32>
      %456 = arith.mulf %455, %454 : vector<16x128xf32>
      %457 = arith.addf %441, %456 : vector<16x128xf32>
      %458 = vector.extract_strided_slice %117 {offsets = [5, 0], sizes = [16, 128], strides = [1, 1]} : vector<24x128xf32> to vector<16x128xf32>
      %459 = vector.broadcast %97 : f32 to vector<16x128xf32>
      %460 = arith.mulf %459, %458 : vector<16x128xf32>
      %461 = arith.addf %445, %460 : vector<16x128xf32>
      %c127_i32_87 = arith.constant 127 : i32
      %462 = tpu.dynamic_rotate %458 by %c127_i32_87 dim 1 : vector<16x128xf32>, i32 -> vector<16x128xf32>
      %463 = vector.broadcast %98 : f32 to vector<16x128xf32>
      %464 = arith.mulf %463, %462 : vector<16x128xf32>
      %465 = arith.addf %449, %464 : vector<16x128xf32>
      %c126_i32_88 = arith.constant 126 : i32
      %466 = tpu.dynamic_rotate %458 by %c126_i32_88 dim 1 : vector<16x128xf32>, i32 -> vector<16x128xf32>
      %467 = vector.broadcast %99 : f32 to vector<16x128xf32>
      %468 = arith.mulf %467, %466 : vector<16x128xf32>
      %469 = arith.addf %453, %468 : vector<16x128xf32>
      %c125_i32_89 = arith.constant 125 : i32
      %470 = tpu.dynamic_rotate %458 by %c125_i32_89 dim 1 : vector<16x128xf32>, i32 -> vector<16x128xf32>
      %471 = vector.broadcast %100 : f32 to vector<16x128xf32>
      %472 = arith.mulf %471, %470 : vector<16x128xf32>
      %473 = arith.addf %457, %472 : vector<16x128xf32>
      %c124_i32_90 = arith.constant 124 : i32
      %474 = tpu.dynamic_rotate %458 by %c124_i32_90 dim 1 : vector<16x128xf32>, i32 -> vector<16x128xf32>
      %475 = vector.broadcast %101 : f32 to vector<16x128xf32>
      %476 = arith.mulf %475, %474 : vector<16x128xf32>
      %477 = arith.addf %461, %476 : vector<16x128xf32>
      %c123_i32_91 = arith.constant 123 : i32
      %478 = tpu.dynamic_rotate %458 by %c123_i32_91 dim 1 : vector<16x128xf32>, i32 -> vector<16x128xf32>
      %479 = vector.broadcast %102 : f32 to vector<16x128xf32>
      %480 = arith.mulf %479, %478 : vector<16x128xf32>
      %481 = arith.addf %465, %480 : vector<16x128xf32>
      %c122_i32_92 = arith.constant 122 : i32
      %482 = tpu.dynamic_rotate %458 by %c122_i32_92 dim 1 : vector<16x128xf32>, i32 -> vector<16x128xf32>
      %483 = vector.broadcast %103 : f32 to vector<16x128xf32>
      %484 = arith.mulf %483, %482 : vector<16x128xf32>
      %485 = arith.addf %469, %484 : vector<16x128xf32>
      %486 = vector.extract_strided_slice %117 {offsets = [6, 0], sizes = [16, 128], strides = [1, 1]} : vector<24x128xf32> to vector<16x128xf32>
      %487 = vector.broadcast %104 : f32 to vector<16x128xf32>
      %488 = arith.mulf %487, %486 : vector<16x128xf32>
      %489 = arith.addf %473, %488 : vector<16x128xf32>
      %c127_i32_93 = arith.constant 127 : i32
      %490 = tpu.dynamic_rotate %486 by %c127_i32_93 dim 1 : vector<16x128xf32>, i32 -> vector<16x128xf32>
      %491 = vector.broadcast %105 : f32 to vector<16x128xf32>
      %492 = arith.mulf %491, %490 : vector<16x128xf32>
      %493 = arith.addf %477, %492 : vector<16x128xf32>
      %c126_i32_94 = arith.constant 126 : i32
      %494 = tpu.dynamic_rotate %486 by %c126_i32_94 dim 1 : vector<16x128xf32>, i32 -> vector<16x128xf32>
      %495 = vector.broadcast %106 : f32 to vector<16x128xf32>
      %496 = arith.mulf %495, %494 : vector<16x128xf32>
      %497 = arith.addf %481, %496 : vector<16x128xf32>
      %c125_i32_95 = arith.constant 125 : i32
      %498 = tpu.dynamic_rotate %486 by %c125_i32_95 dim 1 : vector<16x128xf32>, i32 -> vector<16x128xf32>
      %499 = vector.broadcast %107 : f32 to vector<16x128xf32>
      %500 = arith.mulf %499, %498 : vector<16x128xf32>
      %501 = arith.addf %485, %500 : vector<16x128xf32>
      %c124_i32_96 = arith.constant 124 : i32
      %502 = tpu.dynamic_rotate %486 by %c124_i32_96 dim 1 : vector<16x128xf32>, i32 -> vector<16x128xf32>
      %503 = vector.broadcast %108 : f32 to vector<16x128xf32>
      %504 = arith.mulf %503, %502 : vector<16x128xf32>
      %505 = arith.addf %489, %504 : vector<16x128xf32>
      %c123_i32_97 = arith.constant 123 : i32
      %506 = tpu.dynamic_rotate %486 by %c123_i32_97 dim 1 : vector<16x128xf32>, i32 -> vector<16x128xf32>
      %507 = vector.broadcast %109 : f32 to vector<16x128xf32>
      %508 = arith.mulf %507, %506 : vector<16x128xf32>
      %509 = arith.addf %493, %508 : vector<16x128xf32>
      %c122_i32_98 = arith.constant 122 : i32
      %510 = tpu.dynamic_rotate %486 by %c122_i32_98 dim 1 : vector<16x128xf32>, i32 -> vector<16x128xf32>
      %511 = vector.broadcast %110 : f32 to vector<16x128xf32>
      %512 = arith.mulf %511, %510 : vector<16x128xf32>
      %513 = arith.addf %497, %512 : vector<16x128xf32>
      %514 = arith.addf %509, %513 : vector<16x128xf32>
      %515 = arith.addf %501, %505 : vector<16x128xf32>
      %516 = arith.addf %514, %515 : vector<16x128xf32>
      %517 = vector.extract_strided_slice %516 {offsets = [0, 0], sizes = [16, 16], strides = [1, 1]} : vector<16x128xf32> to vector<16x16xf32>
      %518 = arith.negf %517 : vector<16x16xf32>
      %519 = math.exp %518 : vector<16x16xf32>
      %cst_99 = arith.constant 1.000000e+00 : f32
      %520 = vector.broadcast %cst_99 : f32 to vector<16x16xf32>
      %521 = arith.addf %520, %519 : vector<16x16xf32>
      %522 = arith.divf %520, %521 : vector<16x16xf32>
      %c0_100 = arith.constant 0 : index
      %c0_101 = arith.constant 0 : index
      %c0_102 = arith.constant 0 : index
      %c0_103 = arith.constant 0 : index
      %523 = vector.load %arg5[%c0_100, %c0_101, %c0_102, %c0_103] : memref<1x1x16x16xf32, #tpu.memory_space<vmem>>, vector<1x1x16x16xf32>
      %524 = vector.shape_cast %523 : vector<1x1x16x16xf32> to vector<16x16xf32>
      %525 = vector.shape_cast %522 : vector<16x16xf32> to vector<1x1x16x16xf32>
      tpu.vector_store %arg5[%c0_100, %c0_101, %c0_102, %c0_103], %525 {strides = array<i32>} : memref<1x1x16x16xf32, #tpu.memory_space<vmem>>, vector<1x1x16x16xf32>,
    } else {
    }
    return
  }
  func.func @transform_0(%arg0: i32, %arg1: i32) -> (i32, i32, i32, i32) {
    %c0_i32 = arith.constant 0 : i32
    %c0_i32_0 = arith.constant 0 : i32
    %c0_i32_1 = arith.constant 0 : i32
    return %arg0, %arg1, %c0_i32, %c0_i32_0 : i32, i32, i32, i32
  }
  func.func @transform_1(%arg0: i32, %arg1: i32) -> i32 {
    %c0_i32 = arith.constant 0 : i32
    %c0_i32_0 = arith.constant 0 : i32
    return %c0_i32 : i32
  }
  func.func @transform_2(%arg0: i32, %arg1: i32) -> i32 {
    %c0_i32 = arith.constant 0 : i32
    %c0_i32_0 = arith.constant 0 : i32
    return %c0_i32 : i32
  }
  func.func @transform_3(%arg0: i32, %arg1: i32) -> (i32, i32, i32, i32) {
    %c0_i32 = arith.constant 0 : i32
    %c0_i32_0 = arith.constant 0 : i32
    %c0_i32_1 = arith.constant 0 : i32
    %c0_i32_2 = arith.constant 0 : i32
    return %arg0, %c0_i32, %c0_i32_0, %c0_i32_1 : i32, i32, i32, i32
  }
}

</mosaic_0001>

<bundles_post_ra>
// kernel: tpu_custom_call.1
= control target key start
LH: loop header
LB: loop body
LE: loop exit
PB: predicated region body
PF: predicated region fallthrough
CT: control target
= control target key end

     0   :  { %s3336_s0 = inlined_call_operand.hbm [shape: f32[2,4,16,16], index: 0, kind: input, shape index: {}]   ;;  %s3337_s1 = inlined_call_operand.vmem [shape: f32[98], index: 1, kind: input, shape index: {}]   ;;  %s3338_s2 = inlined_call_operand.<no memory space> [shape: f32[1], index: 2, kind: input, shape index: {}]   ;;  %s3339_s3 = inlined_call_operand.hbm [shape: f32[2,1,16,16], index: 3, kind: output, shape index: {}]  }
   0x1   :  { %8 = sst [smem:[#allocation3]] %s3338_s2 }
   0x2   :  { %9 = vsyncpa [#allocation5], 0 }
   0x3   :  { %11 = vsyncpa [#allocation5 + $0x1], 0 }
   0x4   :  { %12 = vsyncpa [#allocation7], 0 }
   0x5   :  { %13 = vsyncpa [#allocation6], 0 }
   0x6   :  { %15 = vsyncpa [#allocation6 + $0x1], 0  ;;  %s2006_s14 = smov 0   ;;  %s2008_s15 = smov 0  }
   0x7   :  { %s2010_s16 = smov 0   ;;  %s2012_s17 = smov 0  }
   0x8   :  { %s2014_s18 = smov 0   ;;  %s2016_s19 = smov 0  }
   0x9 LB: > { %s1622_s2 = sadd.s32 4294967295, %s1966_s19   ;;  %s1623_s20 = sadd.s32 4294967294, %s1966_s19   ;;  %s1966_s19 = sphi %s2016_s19, %s21_s19   ;;  %s1962_s18 = sphi %s2014_s18, %s3453_s18   ;;  %s1958_s17 = sphi %s2012_s17, %s3452_s17   ;;  %s1954_s16 = sphi %s2010_s16, %s3451_s16   ;;  %s1950_s15 = sphi %s2008_s15, %s3450_s15   ;;  %s1946_s14 = sphi %s2006_s14, %s3449_s14  }
   0xa   : > { %s42_s21 = sadd.s32 1, %s1954_s16  ;;  %p49_p0 = scmp.ne.s32.totalorder %s1954_s16, %s1950_s15 }
   0xb   : > { %p50_p1 = scmp.eq.s32.totalorder %s1966_s19, 0  ;;  %p55_p2 = scmp.ne.s32.totalorder %s1950_s15, %s1946_s14 }
   0xc   : > { %p2044_p3 = scmp.eq.s32.totalorder %s1622_s2, 0  ;;  %p121_p4 = scmp.eq.s32.totalorder %s1622_s2, 1 }
   0xd   : > { %p2048_p5 = por %p50_p1, %p49_p0  ;;  %p127_p6 = scmp.eq.s32.totalorder %s1623_s20, 1 }
   0xe   : > { %s3368_s22 = scalar_select %p2044_p3, 1, 0 }
   0xf   : > { %p2054_p7 = por %p2044_p3, %p55_p2  ;;  %p2058_p8 = por %p121_p4, %p49_p0 }
  0x10   : > { %p2062_p9 = por %p127_p6, %p55_p2  ;;  %p1624_p10 = scmp.ge.s32.totalorder %s1966_s19, 1 }
  0x11   : > { %s3370_s24 = scalar_select %p2054_p7, 1, 0 }
  0x12   : > { %s3371_s25 = scalar_select %p2058_p8, 1, 0 }
  0x13   : > { %s3372_s26 = scalar_select %p2062_p9, 1, 0 }
  0x14   : > { %p134_p11 = scmp.lt.s32.totalorder %s1966_s19, 3  ;;  %s147_s29 = sshll.u32 %s3337_s1, 4  ;;  %s148_s29 = int_to_ptr.vmem [resolvable:$true] %s147_s29 }
  0x15   : > { %p1761_p0 = scmp.lt.s32.totalorder %s1966_s19, 2  ;;  %s33_s6 = sadd.s32 1, %s1962_s18 }
  0x16   : > { %p2071_p12 = pnand %p1624_p10, %p134_p11  ;;  %p2092_p6 = scmp.ge.s32.totalorder %s33_s6, 2 }
  0x17   : > { %p2081_p2 = pnand %p1761_p0, %p2048_p5  ;;  %s161_s8 = sand.u32 1, %s1954_s16  }
  0x18   : > { %p1748_p1 = pneg %p2071_p12  ;;  %s1835_s9 = scalar_lea.vmem %s148_s29, 16 }
  0x19   : > { %p1836_p10 = scmp.ne.s32.totalorder %s148_s29, %s1835_s9  ;;  %p1843_p13 = scmp.lt.s32.totalorder %s148_s29, %s148_s29 }
  0x1a   : > { %p2087_p4 = pnand %p1748_p1, %p2044_p3  ;;  %p1844_p9 = scmp.lt.s32.totalorder %s1835_s9, %s1835_s9 }
  0x1c   : > { %p1837_p11 = pneg %p2087_p4  ;;  %p1845_p8 = por %p1844_p9, %p1843_p13 }
  0x1e   : > { %p1838_p5 = pnand %p1837_p11, %p1836_p10 }
  0x20   : > { %p1839_p0 = pneg %p1838_p5 }
  0x22   : > { %p1846_p1 = pnand %p1845_p8, %p1839_p0 }
  0x24   : > { %1849 = shalt.err (!%p1846_p1)
}
  0x25   : > { %s1968_s10 = smov [#allocation8]   ;;  %s3455_s6 = smov (%p2092_p6, %s33_s6), 0 }
  0x26   : > { %1751 = dma.vmem_to_smem (!%p2087_p4), %s148_s29, 16, %s1968_s10, [#allocation7]  }
  0x27   : > { %s1627_s11 = sshll.u32 %s161_s8, 6  ;;  %s37_s12 = ssub.s32 %s1962_s18, %s3455_s6 }
  0x28   : > { %p40_p9 = scmp.eq.s32.totalorder %s37_s12, 0  ;;  %s1738_s13 = sshll.u32 %s1962_s18, 10 }
  0x29   : > { %s2111_s23 = scalar_lea.hbm %s3336_s0, %s1738_s13  ;;  %s165_s27 = scalar_lea.vmem [#allocation4], %s1627_s11 }
  0x2a   : > { %s175_s28 = sshll.u32 %s165_s27, 4  ;;  %s2120_s5 = scalar_lea.sflag [#allocation5], %s161_s8  ;;  %s2118_s28 = int_to_ptr.vmem [resolvable:$true] %s175_s28 }
  0x2b   : > { %s2116_s29 = scalar_select %p40_p9, %s1954_s16, %s42_s21  }
  0x2c   : > { %s1850_s7 = scalar_lea.hbm %s2111_s23, 1024  ;;  %p1852_p13 = pneg %p2081_p2 }
  0x2d   : > { %p1851_p8 = scmp.ne.s32.totalorder %s2111_s23, %s1850_s7  ;;  %s1855_s11 = scalar_lea.hbm %s3336_s0, 2048 }
  0x2e   : > { %p1856_p10 = scmp.lt.u32.totalorder %s2111_s23, %s3336_s0  ;;  %p1857_p11 = scmp.lt.u32.totalorder %s1855_s11, %s1850_s7 }
  0x2f   : > { %p1853_p4 = pnand %p1852_p13, %p1851_p8  ;;  %p1859_p0 = scmp.lt.u32.totalorder %s1850_s7, %s2111_s23 }
  0x30   : > { %p1858_p5 = por %p1857_p11, %p1856_p10 }
  0x31   : > { %p1854_p6 = pneg %p1853_p4 }
  0x32   : > { %p1860_p1 = por %p1859_p0, %p1858_p5 }
  0x34   : > { %p1861_p9 = pnand %p1860_p1, %p1854_p6 }
  0x36   : > { %1864 = shalt.err (!%p1861_p9)
}
  0x37   : > { %s1865_s21 = scalar_lea.vmem %s2118_s28, 1024  ;;  %s1969_s8 = smov [#allocation4]  }
  0x38   : > { %p1866_p8 = scmp.ne.s32.totalorder %s2118_s28, %s1865_s21  ;;  %s1870_s2 = sshll.u32 %s1969_s8, 4  ;;  %s1871_s2 = int_to_ptr.vmem [resolvable:$false] %s1870_s2 }
  0x39   : > { %s1872_s20 = scalar_lea.vmem %s1871_s2, 2048  ;;  %p1873_p7 = scmp.lt.s32.totalorder %s2118_s28, %s1871_s2 }
  0x3a   : > { %p1868_p4 = pnand %p1866_p8, %p1852_p13  ;;  %p1874_p10 = scmp.lt.s32.totalorder %s1872_s20, %s1865_s21 }
  0x3c   : > { %p1869_p3 = pneg %p1868_p4  ;;  %p1875_p11 = por %p1874_p10, %p1873_p7 }
  0x3e   : > { %p1876_p5 = pnand %p1875_p11, %p1869_p3 }
  0x40   : > { %1879 = shalt.err (!%p1876_p5)
}
  0x41   : > { %s1970_s27 = smov 128   ;;  %s1971_s7 = smov 8  }
  0x42   : > { %1755 = dma.hbm_to_vmem [thread:$0]  (!%p2081_p2), %s2111_s23, 1024, %s2118_s28, %s2120_s5, %s1970_s27, %s1970_s27, %s1971_s7  }
  0x43   : > { %187 = sbr.rel (%p2071_p12) target bundleno = 716 (0x2cc), region = 32 }
  0x4a   : > { %s2151_s9 = sand.u32 1, %s1950_s15   ;;  %p3377_p3 = scmp.ne.s32.totalorder %s3370_s24, 0 }
  0x4b   : > { %s1631_s10 = sshll.u32 %s2151_s9, 6  ;;  %s190_s11 = scalar_lea.sflag [#allocation5], %s2151_s9 }
  0x4c   : > { %s193_s12 = scalar_lea.vmem [#allocation4], %s1631_s10 }
  0x4d   : > { %1933 = dma.done.wait (%p3377_p3), %s190_s11, 1024  }
  0x4e   : > { %1935 = vsyncadd (%p3377_p3), %s190_s11, 4294966272  ;;  %p3378_p7 = scmp.ne.s32.totalorder %s3368_s22, 0 }
  0x50   : > { %1937 = dma.done.wait (%p3378_p7), [#allocation7], 16  }
  0x51   : > { %1939 = vsyncadd (%p3378_p7), [#allocation7], 4294967280 }
  0x52   : > { %202 = sfence }
  0x53   : > { %v222_v0 = vld [vmem:[%s193_s12] sm:$0xff]  ;;  %v224_v1 = vld [vmem:[%s193_s12 + $0x10] sm:$0xff]  ;;  %vm230_vm0 = vcmask 130048   ;;  %v223_v7 = vld [vmem:[%s193_s12 + $0x8] sm:$0xff]  ;;  %v1972_v9 = vmov 0.0   ;;  %s1973_s22 = smov 3  }
  0x54   : > { %v226_v2 = vld [vmem:[%s193_s12 + $0x20] sm:$0xff]  ;;  %v228_v3 = vld [vmem:[%s193_s12 + $0x30] sm:$0xff]  ;;  %v231_v4 = vsel %vm230_vm0, %v222_v0, 0.0  ;;  %v232_v5 = vsel %vm230_vm0, %v224_v1, 0.0  ;;  %v225_v8 = vld [vmem:[%s193_s12 + $0x18] sm:$0xff]  ;;  %263 = vst [vmem:[#allocation2] sm:$0xff] %v1972_v9 }
  0x55   : > { %v234_v6 = vsel %vm230_vm0, %v226_v2, 0.0  ;;  %264 = vst [vmem:[#allocation2 + $0x8] sm:$0xff] %v1972_v9  ;;  %265 = vst [vmem:[#allocation2 + $0x10] sm:$0xff] %v1972_v9  ;;  %v233_v10 = vadd.f32 %v232_v5, %v231_v4  ;;  %v227_v11 = vld [vmem:[%s193_s12 + $0x28] sm:$0xff]  ;;  %v229_v12 = vld [vmem:[%s193_s12 + $0x38] sm:$0xff]  ;;  %v238_v13 = vsel %vm230_vm0, %v223_v7, 0.0 }
  0x56   : > { %266 = vst [vmem:[#allocation2 + $0x18] sm:$0xff] %v1972_v9  ;;  %267 = vst [vmem:[#allocation2 + $0x20] sm:$0xff] %v1972_v9  ;;  %v239_v14 = vsel %vm230_vm0, %v225_v8, 0.0  ;;  %v236_v15 = vsel %vm230_vm0, %v228_v3, 0.0  ;;  %v241_v17 = vsel %vm230_vm0, %v227_v11, 0.0  ;;  %v243_v18 = vsel %vm230_vm0, %v229_v12, 0.0 }
  0x57   : > { %268 = vst [vmem:[#allocation2 + $0x28] sm:$0xff] %v1972_v9  ;;  %v240_v16 = vadd.f32 %v239_v14, %v238_v13  ;;  %v235_v19 = vadd.f32 %v234_v6, %v233_v10  ;;  %v245_v20 = vsel %vm230_vm0, %v222_v0, -inf  ;;  %v246_v21 = vsel %vm230_vm0, %v224_v1, -inf  ;;  %s1640_s24 = sld [smem:[#allocation8 + $0x7]]  ;;  %s1647_s30 = sld [smem:[#allocation8 + $0xe]] }
  0x58   : > { %v247_v22 = vsel %vm230_vm0, %v226_v2, -inf  ;;  %v249_v25 = vsel %vm230_vm0, %v228_v3, -inf  ;;  %v252_v26 = vsel %vm230_vm0, %v223_v7, -inf  ;;  %v253_v29 = vsel %vm230_vm0, %v225_v8, -inf  ;;  %s1654_s4 = sld [smem:[#allocation8 + $0x15]]  ;;  %s1974_s23 = smov 127  }
  0x59   : > { %v242_v23 = vadd.f32 %v241_v17, %v240_v16  ;;  %v248_v24 = vmax.f32 %v245_v20, %v247_v22  ;;  %v237_v27 = vadd.f32 %v236_v15, %v235_v19  ;;  %v250_v28 = vmax.f32 %v246_v21, %v249_v25  ;;  %s1975_s28 = smov 126   ;;  %s2198_s5 = sld [smem:[#allocation8 + $0x1c]] }
  0x5a   : > { %v254_v30 = vsel %vm230_vm0, %v227_v11, -inf  ;;  %v256_v32 = vsel %vm230_vm0, %v229_v12, -inf  ;;  %vm277_vm1 = vcmask 154648   ;;  %vm663_vm2 = vcmask 1044480   ;;  %s1976_s13 = smov 125   ;;  %s2229_s21 = sld [smem:[#allocation8 + $0x23]] }
  0x5b   : > { %v255_v31 = vmax.f32 %v252_v26, %v254_v30  ;;  %271 = vrot.lane.b32.xlu0 %v237_v27, %s1973_s22  ;;  %v244_v33 = vadd.f32 %v243_v18, %v242_v23  ;;  %v251_v34 = vmax.f32 %v248_v24, %v250_v28  ;;  %v257_v35 = vmax.f32 %v253_v29, %v256_v32  ;;  %s1977_s8 = smov 124   ;;  %s2249_s2 = sld [smem:[#allocation8 + $0x2a]] }
  0x5c   : > { %vm741_vm3 = vcmask 1043456   ;;  %vm819_vm4 = vcmask 1042432   ;;  %vm897_vm5 = vcmask 1041408   ;;  %vm504_vm6 = vcmask 1046528   ;;  %s1978_s20 = smov 123   ;;  %s1979_s27 = smov 122  }
  0x5d   : > { %282 = vrot.lane.b32.xlu1 %v251_v34, %s1973_s22  ;;  %v258_v36 = vmax.f32 %v255_v31, %v257_v35  ;;  %v497_v47 = vstv %s1640_s24  ;;  %v578_v55 = vstv %s1647_s30  ;;  %vm585_vm7 = vcmask 1045504   ;;  %s2296_s7 = sld [smem:[#allocation8 + $0x38]]  ;;  %s1696_s10 = sld [smem:[#allocation8 + $0x3f]] }
  0x5e   : > { %v656_v56 = vstv %s1654_s4  ;;  %s1703_s11 = sld [smem:[#allocation8 + $0x46]]  ;;  %s1710_s12 = sld [smem:[#allocation8 + $0x4d]] }
  0x5f   : > { %273 = vrot.lane.b32.xlu0 %v244_v33, %s1973_s22  ;;  %v734_v20 = vstv %s2198_s5  ;;  %s1724_s24 = sld [smem:[#allocation8 + $0x5b]]  ;;  %s2608_s30 = sld [smem:[#allocation8]] }
  0x60   : > { %v812_v32 = vstv %s2229_s21  ;;  %s2612_s4 = sld [smem:[#allocation8 + $0x4]]  ;;  %s2618_s5 = sld [smem:[#allocation3]] }
  0x61   : > { %284 = vrot.lane.b32.xlu1 %v258_v36, %s1973_s22  ;;  %s1717_s22 = sld [smem:[#allocation8 + $0x54]]  ;;  %s2620_s21 = sld [smem:[#allocation8 + $0x8]] }
  0x62   : > { %p3446_p2 = scmp.ne.s32.totalorder %s3371_s25, 0 }
  0xcd   : > { %v272_v37 = vpop.permute.xlu0 %271 }
  0xce   : > { %278 = vst.msk [vmem:[#allocation2 + $0x3] sm:$0xff] %vm277_vm1, %v272_v37 }
  0xcf   : > { %v283_v38 = vpop.permute.xlu1 %282 }
  0xd0   : > { %289 = vst.msk [vmem:[#allocation2 + $0x1b] sm:$0xff] %vm277_vm1, %v283_v38  ;;  %v890_v38 = vstv %s2249_s2  ;;  %s2626_s2 = sld [smem:[#allocation8 + $0xc]] }
  0xd1   : > { %v274_v39 = vpop.permute.xlu0 %273 }
  0xd2   : > { %279 = vst.msk [vmem:[#allocation2 + $0xb] sm:$0xff] %vm277_vm1, %v274_v39 }
  0xd3   : > { %v285_v40 = vpop.permute.xlu1 %284 }
  0xd4   : > { %290 = vst.msk [vmem:[#allocation2 + $0x23] sm:$0xff] %vm277_vm1, %v285_v40 }
  0xd5   : > { %v427_v41 = vld [vmem:[#allocation2] sm:$0xff] }
  0xd6   : > { %v2179_v42 = vmul.f32 0.25, %v427_v41 }
  0xd8   : > { %443 = vrot.lane.b32.xlu0 %v2179_v42, %s1974_s23  ;;  %v673_v48 = vrot.slane %v2179_v42, 3  ;;  %v751_v49 = vrot.slane %v2179_v42, 4  ;;  %v498_v53 = vmul.f32 %v497_v47, %v2179_v42  ;;  %v829_v54 = vrot.slane %v2179_v42, 5 }
  0xd9   : > { %v428_v43 = vld [vmem:[#allocation2 + $0x8] sm:$0xff]  ;;  %v429_v44 = vld [vmem:[#allocation2 + $0x10] sm:$0xff]  ;;  %v907_v60 = vrot.slane %v2179_v42, 6  ;;  %v579_v4 = vmul.f32 %v578_v55, %v2179_v42  ;;  %v657_v11 = vmul.f32 %v656_v56, %v2179_v42  ;;  %v735_v27 = vmul.f32 %v734_v20, %v2179_v42 }
  0xda   : > { %v2183_v45 = vmul.f32 0.25, %v428_v43  ;;  %v2185_v46 = vmul.f32 0.25, %v429_v44  ;;  %v505_v1 = vrot.slane %v498_v53, 1  ;;  %v517_v36 = vrot.slane %v2179_v42, 1 }
  0xdb   : > { %v586_v17 = vrot.slane %v579_v4, 2  ;;  %v664_v23 = vrot.slane %v657_v11, 3  ;;  %v742_v34 = vrot.slane %v735_v27, 4  ;;  %v2282_v39 = vld [vmem:[#allocation2 + $0x20] sm:$0xff]  ;;  %v2284_v40 = vld [vmem:[#allocation2 + $0x28] sm:$0xff]  ;;  %v813_v43 = vmul.f32 %v812_v32, %v2179_v42 }
  0xdc   : > { %452 = vrot.lane.b32.xlu0 %v2179_v42, %s1975_s28  ;;  %445 = vrot.lane.b32.xlu1 %v2183_v45, %s1974_s23  ;;  %v674_v50 = vrot.slane %v2183_v45, 3  ;;  %v752_v51 = vrot.slane %v2183_v45, 4  ;;  %v754_v52 = vrot.slane %v2185_v46, 4  ;;  %v830_v61 = vrot.slane %v2183_v45, 5 }
  0xdd   : > { %v499_v62 = vmul.f32 %v497_v47, %v2183_v45  ;;  %v832_v63 = vrot.slane %v2185_v46, 5  ;;  %v500_v0 = vmul.f32 %v497_v47, %v2185_v46  ;;  %v908_v2 = vrot.slane %v2183_v45, 6 }
  0xde   : > { %v2203_v57 = vsel %vm663_vm2, %v673_v48, %v674_v50  ;;  %v2206_v58 = vsel %vm741_vm3, %v751_v49, %v752_v51  ;;  %v2209_v59 = vsel %vm741_vm3, %v752_v51, %v754_v52  ;;  %v910_v3 = vrot.slane %v2185_v46, 6 }
  0xdf   : > { %v2224_v5 = vsel %vm819_vm4, %v829_v54, %v830_v61  ;;  %v506_v6 = vrot.slane %v499_v62, 1  ;;  %v2227_v7 = vsel %vm819_vm4, %v830_v61, %v832_v63  ;;  %v508_v8 = vrot.slane %v500_v0, 1 }
  0xe0   : > { %461 = vrot.lane.b32.xlu0 %v2179_v42, %s1976_s13  ;;  %454 = vrot.lane.b32.xlu1 %v2183_v45, %s1975_s28  ;;  %v2232_v9 = vsel %vm897_vm5, %v907_v60, %v908_v2  ;;  %v2235_v10 = vsel %vm897_vm5, %v908_v2, %v910_v3  ;;  %v580_v14 = vmul.f32 %v578_v55, %v2183_v45  ;;  %v518_v33 = vrot.slane %v2183_v45, 1 }
  0xe1   : > { %v2243_v12 = vsel %vm504_vm6, %v505_v1, %v506_v6  ;;  %v2246_v13 = vsel %vm504_vm6, %v506_v6, %v508_v8  ;;  %v581_v15 = vmul.f32 %v578_v55, %v2185_v46  ;;  %v658_v16 = vmul.f32 %v656_v56, %v2183_v45 }
  0xe2   : > { %v587_v18 = vrot.slane %v580_v14, 2  ;;  %v659_v19 = vmul.f32 %v656_v56, %v2185_v46  ;;  %v736_v28 = vmul.f32 %v734_v20, %v2183_v45  ;;  %v737_v31 = vmul.f32 %v734_v20, %v2185_v46 }
  0xe3   : > { %v589_v21 = vrot.slane %v581_v15, 2  ;;  %v665_v24 = vrot.slane %v658_v16, 3  ;;  %v814_v44 = vmul.f32 %v812_v32, %v2183_v45  ;;  %v815_v47 = vmul.f32 %v812_v32, %v2185_v46 }
  0xe4   : > { %470 = vrot.lane.b32.xlu0 %v2179_v42, %s1977_s8  ;;  %463 = vrot.lane.b32.xlu1 %v2183_v45, %s1976_s13  ;;  %v2260_v22 = vsel %vm585_vm7, %v586_v17, %v587_v18  ;;  %v667_v25 = vrot.slane %v659_v19, 3  ;;  %v743_v35 = vrot.slane %v736_v28, 4  ;;  %v745_v37 = vrot.slane %v737_v31, 4 }
  0xe5   : > { %v2263_v26 = vsel %vm585_vm7, %v587_v18, %v589_v21  ;;  %v2268_v29 = vsel %vm663_vm2, %v664_v23, %v665_v24  ;;  %v520_v48 = vrot.slane %v2185_v46, 1  ;;  %v2299_v51 = vsel %vm504_vm6, %v517_v36, %v518_v33 }
  0xe6   : > { %3379 = vst [vmem:[#allocation13_spill] sm:$0xff] %v2268_v29  ;;  %v2271_v30 = vsel %vm663_vm2, %v665_v24, %v667_v25  ;;  %v2287_v41 = vsel %vm741_vm3, %v742_v34, %v743_v35  ;;  %v2294_v49 = vsel %vm741_vm3, %v743_v35, %v745_v37  ;;  %v820_v52 = vrot.slane %v813_v43, 5 }
  0xe7   : > { %3380 = vst [vmem:[#allocation14_spill] sm:$0xff] %v2271_v30  ;;  %v821_v53 = vrot.slane %v814_v44, 5  ;;  %v823_v54 = vrot.slane %v815_v47, 5  ;;  %v3352_v55 = vrot.slane %v2282_v39, 4  ;;  %v1280_v56 = vrot.slane %v2284_v40, 4 }
  0xe8   : > { %479 = vrot.lane.b32.xlu0 %v2179_v42, %s1978_s20  ;;  %472 = vrot.lane.b32.xlu1 %v2183_v45, %s1977_s8  ;;  %v891_v60 = vmul.f32 %v890_v38, %v2179_v42  ;;  %v892_v61 = vmul.f32 %v890_v38, %v2183_v45  ;;  %v893_v0 = vmul.f32 %v890_v38, %v2185_v46  ;;  %v3351_v8 = vrot.slane %v2282_v39, 5 }
  0xe9   : > { %v2310_v62 = vsel %vm819_vm4, %v820_v52, %v821_v53  ;;  %v2313_v63 = vsel %vm819_vm4, %v821_v53, %v823_v54  ;;  %v2319_v1 = vsel %vm741_vm3, %v3352_v55, %v1280_v56  ;;  %v521_v4 = vsel %vm504_vm6, %v518_v33, %v520_v48 }
  0xea   : > { %3381 = vst [vmem:[#allocation15_spill] sm:$0xff] %v2319_v1  ;;  %v898_v2 = vrot.slane %v891_v60, 6  ;;  %v899_v3 = vrot.slane %v892_v61, 6  ;;  %v901_v6 = vrot.slane %v893_v0, 6  ;;  %v1357_v11 = vrot.slane %v2284_v40, 5 }
  0xeb   : > { %v3349_v15 = vrot.slane %v2282_v39, 6  ;;  %v1434_v18 = vrot.slane %v2284_v40, 6  ;;  %v2341_v19 = vstv %s2296_s7  ;;  %v2357_v24 = vstv %s1696_s10  ;;  %s2633_s7 = sld [smem:[#allocation8 + $0x10]]  ;;  %s2644_s10 = sld [smem:[#allocation8 + $0x14]] }
  0xec   : > { %488 = vrot.lane.b32.xlu0 %v2179_v42, %s1979_s27  ;;  %481 = vrot.lane.b32.xlu1 %v2183_v45, %s1978_s20  ;;  %v2328_v14 = vsel %vm897_vm5, %v898_v2, %v899_v3  ;;  %v2332_v16 = vsel %vm897_vm5, %v899_v3, %v901_v6  ;;  %v2337_v17 = vsel %vm819_vm4, %v3351_v8, %v1357_v11  ;;  %v2359_v25 = vstv %s1703_s11  ;;  %s2657_s11 = sld [smem:[#allocation8 + $0x18]] }
  0xed   : > { %3382 = vst [vmem:[#allocation16_spill] sm:$0xff] %v2328_v14  ;;  %3383 = vst [vmem:[#allocation17_spill] sm:$0xff] %v2332_v16  ;;  %v2345_v20 = vmul.f32 %v2341_v19, %v2282_v39  ;;  %v1030_v21 = vmul.f32 %v2341_v19, %v2284_v40  ;;  %v2355_v23 = vsel %vm897_vm5, %v3349_v15, %v1434_v18  ;;  %v2384_v43 = vstv %s1710_s12  ;;  %s2687_s12 = sld [smem:[#allocation8 + $0x3]] }
  0xee   : > { %3384 = vst [vmem:[#allocation18_spill] sm:$0xff] %v2337_v17  ;;  %3385 = vst [vmem:[#allocation19_spill] sm:$0xff] %v2341_v19  ;;  %v2364_v31 = vmul.f32 %v2357_v24, %v2282_v39  ;;  %v1110_v32 = vmul.f32 %v2357_v24, %v2284_v40  ;;  %v2370_v33 = vmul.f32 %v2359_v25, %v2282_v39  ;;  %v2386_v44 = vstv %s1717_s22  ;;  %s2694_s22 = sld [smem:[#allocation8 + $0xb]] }
  0xef   : > { %3386 = vst [vmem:[#allocation20_spill] sm:$0xff] %v2345_v20  ;;  %3387 = vst [vmem:[#allocation21_spill] sm:$0xff] %v2355_v23  ;;  %v3350_v27 = vrot.slane %v2345_v20, 1  ;;  %v1037_v28 = vrot.slane %v1030_v21, 1  ;;  %v1187_v38 = vmul.f32 %v2359_v25, %v2284_v40  ;;  %v2395_v52 = vmul.f32 %v2384_v43, %v2282_v39 }
  0xf0   : > { %490 = vrot.lane.b32.xlu1 %v2183_v45, %s1979_s27  ;;  %524 = vrot.lane.b32.xlu0 %v2299_v51, %s1974_s23  ;;  %3388 = vst [vmem:[#allocation22_spill] sm:$0xff] %v2357_v24  ;;  %3389 = vst [vmem:[#allocation23_spill] sm:$0xff] %v2359_v25  ;;  %v3348_v35 = vrot.slane %v2364_v31, 2  ;;  %v1117_v36 = vrot.slane %v1110_v32, 2  ;;  %v3347_v37 = vrot.slane %v2370_v33, 3  ;;  %v1264_v53 = vmul.f32 %v2384_v43, %v2284_v40 }
  0xf1   : > { %3390 = vst [vmem:[#allocation24_spill] sm:$0xff] %v2364_v31  ;;  %3391 = vst [vmem:[#allocation25_spill] sm:$0xff] %v2370_v33  ;;  %v2375_v34 = vsel %vm504_vm6, %v3350_v27, %v1037_v28  ;;  %v1194_v48 = vrot.slane %v1187_v38, 3  ;;  %v2399_v54 = vstv %s1724_s24  ;;  %v2406_v56 = vmul.f32 %v2386_v44, %v2282_v39  ;;  %s2700_s24 = sld [smem:[#allocation8 + $0xf]] }
  0xf2   : > { %3392 = vst [vmem:[#allocation26_spill] sm:$0xff] %v2375_v34  ;;  %3393 = vst [vmem:[#allocation27_spill] sm:$0xff] %v2384_v43  ;;  %v2391_v47 = vsel %vm585_vm7, %v3348_v35, %v1117_v36  ;;  %v1341_v60 = vmul.f32 %v2386_v44, %v2284_v40  ;;  %v3346_v0 = vrot.slane %v2395_v52, 4  ;;  %v1271_v2 = vrot.slane %v1264_v53, 4 }
  0xf3   : > { %3394 = vst [vmem:[#allocation28_spill] sm:$0xff] %v2386_v44  ;;  %3395 = vst [vmem:[#allocation29_spill] sm:$0xff] %v2391_v47  ;;  %v2413_v61 = vsel %vm663_vm2, %v3347_v37, %v1194_v48  ;;  %v3345_v3 = vrot.slane %v2406_v56, 5  ;;  %v2419_v11 = vmul.f32 %v2399_v54, %v2282_v39  ;;  %v596_v18 = vrot.slane %v2183_v45, 2 }
  0xf4   : > { %526 = vrot.lane.b32.xlu1 %v521_v4, %s1974_s23  ;;  %533 = vrot.lane.b32.xlu0 %v2299_v51, %s1975_s28  ;;  %3396 = vst [vmem:[#allocation30_spill] sm:$0xff] %v2395_v52  ;;  %3397 = vst [vmem:[#allocation31_spill] sm:$0xff] %v2399_v54  ;;  %v1348_v6 = vrot.slane %v1341_v60, 5  ;;  %v2425_v21 = vsel %vm741_vm3, %v3346_v0, %v1271_v2  ;;  %v1418_v36 = vmul.f32 %v2399_v54, %v2284_v40  ;;  %v2602_v54 = vld [vmem:[#allocation2 + $0x18] sm:$0xff] }
  0xf5   : > { %3398 = vst [vmem:[#allocation32_spill] sm:$0xff] %v2406_v56  ;;  %3399 = vst [vmem:[#allocation33_spill] sm:$0xff] %v2413_v61  ;;  %v3344_v32 = vrot.slane %v2419_v11, 6  ;;  %v595_v38 = vrot.slane %v2179_v42, 2  ;;  %v598_v60 = vrot.slane %v2185_v46, 2  ;;  %v438_v44 = vstv %s2608_s30  ;;  %s2707_s30 = sld [smem:[#allocation8 + $0x13]] }
  0xf6   : > { %3400 = vst [vmem:[#allocation34_spill] sm:$0xff] %v2419_v11  ;;  %3401 = vst [vmem:[#allocation35_spill] sm:$0xff] %v2425_v21  ;;  %v2433_v28 = vsel %vm819_vm4, %v3345_v3, %v1348_v6  ;;  %v1425_v48 = vrot.slane %v1418_v36, 6  ;;  %v474_v43 = vstv %s2612_s4  ;;  %v439_v61 = vmul.f32 %v438_v44, %v2179_v42  ;;  %s2714_s4 = sld [smem:[#allocation8 + $0x17]] }
  0xf7   : > { %3402 = vst [vmem:[#allocation36_spill] sm:$0xff] %v2433_v28  ;;  %v597_v53 = vsel %vm585_vm7, %v595_v38, %v596_v18  ;;  %v599_v2 = vsel %vm585_vm7, %v596_v18, %v598_v60  ;;  %v437_v33 = vstv %s2618_s5  ;;  %v528_v25 = vstv %s2620_s21  ;;  %s2728_s5 = sld [smem:[#allocation8 + $0x1b]]  ;;  %s2740_s21 = sld [smem:[#allocation8 + $0x1f]] }
  0xf8   : > { %535 = vrot.lane.b32.xlu1 %v521_v4, %s1975_s28  ;;  %542 = vrot.lane.b32.xlu0 %v2299_v51, %s1976_s13  ;;  %v564_v24 = vstv %s2626_s2  ;;  %v441_v34 = vadd.f32 %v439_v61, %v437_v33  ;;  %v440_v42 = vmul.f32 %v438_v44, %v2183_v45  ;;  %v615_v17 = vstv %s2633_s7  ;;  %s2752_s2 = sld [smem:[#allocation8 + $0x6]]  ;;  %s2762_s7 = sld [smem:[#allocation8 + $0x2]] }
  0xf9   : > { %v1047_v16 = vrot.slane %v2282_v39, 1 }
  0xfa   : > { %v442_v45 = vadd.f32 %v440_v42, %v437_v33 }
  0xfc   : > { %544 = vrot.lane.b32.xlu1 %v521_v4, %s1976_s13  ;;  %551 = vrot.lane.b32.xlu0 %v2299_v51, %s1977_s8 }
 0x100   : > { %553 = vrot.lane.b32.xlu1 %v521_v4, %s1977_s8  ;;  %560 = vrot.lane.b32.xlu0 %v2299_v51, %s1978_s20 }
 0x104   : > { %562 = vrot.lane.b32.xlu1 %v521_v4, %s1978_s20  ;;  %569 = vrot.lane.b32.xlu0 %v2299_v51, %s1979_s27  ;;  %v2446_v51 = vsel %vm897_vm5, %v3344_v32, %v1425_v48 }
 0x105   : > { %3403 = vst [vmem:[#allocation37_spill] sm:$0xff] %v2446_v51 }
 0x108   : > { %571 = vrot.lane.b32.xlu1 %v521_v4, %s1979_s27  ;;  %602 = vrot.lane.b32.xlu0 %v597_v53, %s1974_s23  ;;  %v676_v4 = vrot.slane %v2185_v46, 3 }
 0x10a   : > { %v677_v6 = vsel %vm663_vm2, %v674_v50, %v676_v4 }
 0x10c   : > { %604 = vrot.lane.b32.xlu1 %v599_v2, %s1974_s23  ;;  %611 = vrot.lane.b32.xlu0 %v597_v53, %s1975_s28 }
 0x110   : > { %613 = vrot.lane.b32.xlu1 %v599_v2, %s1975_s28  ;;  %620 = vrot.lane.b32.xlu0 %v597_v53, %s1976_s13 }
 0x114   : > { %622 = vrot.lane.b32.xlu1 %v599_v2, %s1976_s13  ;;  %629 = vrot.lane.b32.xlu0 %v597_v53, %s1977_s8 }
 0x118   : > { %631 = vrot.lane.b32.xlu1 %v599_v2, %s1977_s8  ;;  %638 = vrot.lane.b32.xlu0 %v597_v53, %s1978_s20 }
 0x11c   : > { %640 = vrot.lane.b32.xlu1 %v599_v2, %s1978_s20  ;;  %647 = vrot.lane.b32.xlu0 %v597_v53, %s1979_s27 }
 0x120   : > { %649 = vrot.lane.b32.xlu1 %v599_v2, %s1979_s27  ;;  %680 = vrot.lane.b32.xlu0 %v2203_v57, %s1974_s23 }
 0x124   : > { %682 = vrot.lane.b32.xlu1 %v677_v6, %s1974_s23  ;;  %689 = vrot.lane.b32.xlu0 %v2203_v57, %s1975_s28 }
 0x128   : > { %691 = vrot.lane.b32.xlu1 %v677_v6, %s1975_s28  ;;  %698 = vrot.lane.b32.xlu0 %v2203_v57, %s1976_s13 }
 0x12c   : > { %700 = vrot.lane.b32.xlu1 %v677_v6, %s1976_s13  ;;  %707 = vrot.lane.b32.xlu0 %v2203_v57, %s1977_s8 }
 0x130   : > { %709 = vrot.lane.b32.xlu1 %v677_v6, %s1977_s8  ;;  %716 = vrot.lane.b32.xlu0 %v2203_v57, %s1978_s20 }
 0x134   : > { %718 = vrot.lane.b32.xlu1 %v677_v6, %s1978_s20  ;;  %725 = vrot.lane.b32.xlu0 %v2203_v57, %s1979_s27 }
 0x138   : > { %727 = vrot.lane.b32.xlu1 %v677_v6, %s1979_s27  ;;  %758 = vrot.lane.b32.xlu0 %v2206_v58, %s1974_s23 }
 0x13c   : > { %760 = vrot.lane.b32.xlu1 %v2209_v59, %s1974_s23  ;;  %767 = vrot.lane.b32.xlu0 %v2206_v58, %s1975_s28 }
 0x140   : > { %769 = vrot.lane.b32.xlu1 %v2209_v59, %s1975_s28  ;;  %776 = vrot.lane.b32.xlu0 %v2206_v58, %s1976_s13 }
 0x144   : > { %778 = vrot.lane.b32.xlu1 %v2209_v59, %s1976_s13  ;;  %785 = vrot.lane.b32.xlu0 %v2206_v58, %s1977_s8 }
 0x148   : > { %787 = vrot.lane.b32.xlu1 %v2209_v59, %s1977_s8  ;;  %794 = vrot.lane.b32.xlu0 %v2206_v58, %s1978_s20 }
 0x14a   : > { %v2500_v46 = vpop.permute.xlu0 %443 }
 0x14c   : > { %796 = vrot.lane.b32.xlu1 %v2209_v59, %s1978_s20  ;;  %803 = vrot.lane.b32.xlu0 %v2206_v58, %s1979_s27 }
 0x14e   : > { %v2506_v50 = vpop.permute.xlu1 %445  ;;  %v2508_v57 = vpop.permute.xlu0 %452 }
 0x150   : > { %805 = vrot.lane.b32.xlu1 %v2209_v59, %s1979_s27  ;;  %836 = vrot.lane.b32.xlu0 %v2224_v5, %s1974_s23 }
 0x152   : > { %v2514_v18 = vpop.permute.xlu1 %454  ;;  %v2516_v36 = vpop.permute.xlu0 %461 }
 0x154   : > { %838 = vrot.lane.b32.xlu1 %v2227_v7, %s1974_s23  ;;  %845 = vrot.lane.b32.xlu0 %v2224_v5, %s1975_s28 }
 0x156   : > { %v2522_v58 = vpop.permute.xlu1 %463  ;;  %v2524_v38 = vpop.permute.xlu0 %470 }
 0x157   : > { %v475_v23 = vmul.f32 %v474_v43, %v2524_v38  ;;  %v1046_v38 = vrot.slane %v2602_v54, 1 }
 0x158   : > { %847 = vrot.lane.b32.xlu1 %v2227_v7, %s1975_s28  ;;  %854 = vrot.lane.b32.xlu0 %v2224_v5, %s1976_s13 }
 0x159   : > { %v477_v30 = vadd.f32 %v475_v23, %v441_v34  ;;  %v2678_v23 = vsel %vm504_vm6, %v1046_v38, %v1047_v16  ;;  %v1049_v34 = vrot.slane %v2284_v40, 1 }
 0x15a   : > { %v2530_v59 = vpop.permute.xlu1 %472  ;;  %v2532_v48 = vpop.permute.xlu0 %479 }
 0x15b   : > { %v476_v14 = vmul.f32 %v474_v43, %v2530_v59 }
 0x15c   : > { %856 = vrot.lane.b32.xlu1 %v2227_v7, %s1976_s13  ;;  %863 = vrot.lane.b32.xlu0 %v2224_v5, %s1977_s8 }
 0x15e   : > { %v2538_v53 = vpop.permute.xlu1 %481  ;;  %v2540_v60 = vpop.permute.xlu0 %488 }
 0x160   : > { %865 = vrot.lane.b32.xlu1 %v2227_v7, %s1977_s8  ;;  %872 = vrot.lane.b32.xlu0 %v2224_v5, %s1978_s20 }
 0x162   : > { %v2546_v2 = vpop.permute.xlu1 %490  ;;  %v2548_v4 = vpop.permute.xlu0 %524 }
 0x163   : > { %v529_v20 = vmul.f32 %v528_v25, %v2548_v4 }
 0x164   : > { %874 = vrot.lane.b32.xlu1 %v2227_v7, %s1978_s20  ;;  %881 = vrot.lane.b32.xlu0 %v2224_v5, %s1979_s27 }
 0x165   : > { %v531_v44 = vadd.f32 %v529_v20, %v477_v30  ;;  %v702_v30 = vstv %s2657_s11  ;;  %s2787_s11 = sld [smem:[#allocation8 + $0x12]] }
 0x166   : > { %v2554_v6 = vpop.permute.xlu1 %526  ;;  %v2556_v32 = vpop.permute.xlu0 %533 }
 0x167   : > { %v530_v61 = vmul.f32 %v528_v25, %v2554_v6 }
 0x168   : > { %883 = vrot.lane.b32.xlu1 %v2227_v7, %s1979_s27  ;;  %914 = vrot.lane.b32.xlu0 %v2232_v9, %s1974_s23 }
 0x16a   : > { %v2562_v3 = vpop.permute.xlu1 %535  ;;  %v2564_v0 = vpop.permute.xlu0 %542 }
 0x16b   : > { %3404 = vst [vmem:[#allocation38_spill] sm:$0xff] %v2562_v3 }
 0x16c   : > { %916 = vrot.lane.b32.xlu1 %v2235_v10, %s1974_s23  ;;  %923 = vrot.lane.b32.xlu0 %v2232_v9, %s1975_s28 }
 0x16e   : > { %v2570_v5 = vpop.permute.xlu1 %544  ;;  %v2572_v37 = vpop.permute.xlu0 %551 }
 0x170   : > { %925 = vrot.lane.b32.xlu1 %v2235_v10, %s1975_s28  ;;  %932 = vrot.lane.b32.xlu0 %v2232_v9, %s1976_s13 }
 0x172   : > { %v2578_v7 = vpop.permute.xlu1 %553  ;;  %v561_v35 = vpop.permute.xlu0 %560 }
 0x173   : > { %v565_v29 = vmul.f32 %v564_v24, %v561_v35  ;;  %v478_v35 = vadd.f32 %v476_v14, %v442_v45  ;;  %v465_v45 = vstv %s2687_s12  ;;  %s2793_s12 = sld [smem:[#allocation8 + $0x5]] }
 0x174   : > { %934 = vrot.lane.b32.xlu1 %v2235_v10, %s1976_s13  ;;  %941 = vrot.lane.b32.xlu0 %v2232_v9, %s1977_s8 }
 0x175   : > { %v567_v43 = vadd.f32 %v565_v29, %v531_v44  ;;  %v532_v20 = vadd.f32 %v530_v61, %v478_v35  ;;  %v2692_v29 = vsel %vm504_vm6, %v1047_v16, %v1049_v34  ;;  %v466_v34 = vmul.f32 %v465_v45, %v2516_v36 }
 0x176   : > { %v2584_v15 = vpop.permute.xlu1 %562  ;;  %v2586_v27 = vpop.permute.xlu0 %569  ;;  %v606_v35 = vstv %s2700_s24  ;;  %v467_v36 = vmul.f32 %v465_v45, %v2522_v58  ;;  %s2801_s24 = sld [smem:[#allocation8 + $0x1]] }
 0x177   : > { %v566_v59 = vmul.f32 %v564_v24, %v2584_v15 }
 0x178   : > { %943 = vrot.lane.b32.xlu1 %v2235_v10, %s1977_s8  ;;  %950 = vrot.lane.b32.xlu0 %v2232_v9, %s1978_s20 }
 0x179   : > { %v568_v14 = vadd.f32 %v566_v59, %v532_v20  ;;  %v512_v20 = vadd.f32 %v2243_v12, %v466_v34  ;;  %v729_v12 = vstv %s2728_s5  ;;  %s2817_s5 = sld [smem:[#allocation8 + $0xd]] }
 0x17a   : > { %v2592_v8 = vpop.permute.xlu1 %571  ;;  %v2594_v55 = vpop.permute.xlu0 %602 }
 0x17b   : > { %3405 = vst [vmem:[#allocation39_spill] sm:$0xff] %v2592_v8 }
 0x17c   : > { %952 = vrot.lane.b32.xlu1 %v2235_v10, %s1978_s20  ;;  %959 = vrot.lane.b32.xlu0 %v2232_v9, %s1979_s27 }
 0x17e   : > { %v2600_v51 = vpop.permute.xlu1 %604  ;;  %v612_v11 = vpop.permute.xlu0 %611 }
 0x17f   : > { %v616_v4 = vmul.f32 %v615_v17, %v612_v11 }
 0x180   : > { %961 = vrot.lane.b32.xlu1 %v2235_v10, %s1979_s27  ;;  %973 = vrot.lane.b32.xlu0 %v2602_v54, %s1974_s23 }
 0x181   : > { %v618_v25 = vadd.f32 %v616_v4, %v567_v43  ;;  %v555_v4 = vstv %s2694_s22  ;;  %s2797_s22 = sld [smem:[#allocation8 + $0x16]] }
 0x182   : > { %v614_v28 = vpop.permute.xlu1 %613  ;;  %v2610_v56 = vpop.permute.xlu0 %620 }
 0x183   : > { %3406 = vst [vmem:[#allocation40_spill] sm:$0xff] %v2610_v56  ;;  %v617_v33 = vmul.f32 %v615_v17, %v614_v28 }
 0x184   : > { %975 = vrot.lane.b32.xlu1 %v2282_v39, %s1974_s23  ;;  %982 = vrot.lane.b32.xlu0 %v2602_v54, %s1975_s28 }
 0x185   : > { %v619_v17 = vadd.f32 %v617_v33, %v568_v14  ;;  %v693_v33 = vstv %s2714_s4  ;;  %s2809_s4 = sld [smem:[#allocation8 + $0x1a]] }
 0x186   : > { %v2622_v9 = vpop.permute.xlu1 %622  ;;  %v2624_v10 = vpop.permute.xlu0 %629 }
 0x187   : > { %3407 = vst [vmem:[#allocation41_spill] sm:$0xff] %v2622_v9  ;;  %v651_v9 = vstv %s2644_s10  ;;  %s2764_s10 = sld [smem:[#allocation8 + $0xa]] }
 0x188   : > { %984 = vrot.lane.b32.xlu1 %v2282_v39, %s1975_s28  ;;  %991 = vrot.lane.b32.xlu0 %v2602_v54, %s1976_s13 }
 0x18a   : > { %v2635_v21 = vpop.permute.xlu1 %631  ;;  %v2637_v52 = vpop.permute.xlu0 %638 }
 0x18c   : > { %993 = vrot.lane.b32.xlu1 %v2282_v39, %s1976_s13  ;;  %1000 = vrot.lane.b32.xlu0 %v2602_v54, %s1977_s8 }
 0x18e   : > { %v2649_v47 = vpop.permute.xlu1 %640  ;;  %v648_v31 = vpop.permute.xlu0 %647 }
 0x18f   : > { %v652_v3 = vmul.f32 %v651_v9, %v648_v31 }
 0x190   : > { %1002 = vrot.lane.b32.xlu1 %v2282_v39, %s1977_s8  ;;  %1009 = vrot.lane.b32.xlu0 %v2602_v54, %s1978_s20 }
 0x191   : > { %v654_v15 = vadd.f32 %v652_v3, %v618_v25  ;;  %v607_v25 = vmul.f32 %v606_v35, %v2594_v55  ;;  %v513_v55 = vadd.f32 %v2246_v13, %v467_v36  ;;  %v492_v36 = vstv %s2752_s2  ;;  %s2826_s2 = sld [smem:[#allocation8 + $0x11]] }
 0x192   : > { %v650_v19 = vpop.permute.xlu1 %649  ;;  %v2662_v1 = vpop.permute.xlu0 %680 }
 0x193   : > { %v653_v24 = vmul.f32 %v651_v9, %v650_v19 }
 0x194   : > { %1011 = vrot.lane.b32.xlu1 %v2282_v39, %s1978_s20  ;;  %1018 = vrot.lane.b32.xlu0 %v2602_v54, %s1979_s27 }
 0x195   : > { %v655_v3 = vadd.f32 %v653_v24, %v619_v17 }
 0x196   : > { %v2673_v8 = vpop.permute.xlu1 %682  ;;  %v2675_v56 = vpop.permute.xlu0 %689 }
 0x198   : > { %1020 = vrot.lane.b32.xlu1 %v2282_v39, %s1979_s27  ;;  %1053 = vrot.lane.b32.xlu0 %v2678_v23, %s1974_s23 }
 0x19a   : > { %v2689_v11 = vpop.permute.xlu1 %691  ;;  %v699_v6 = vpop.permute.xlu0 %698 }
 0x19b   : > { %v703_v31 = vmul.f32 %v702_v30, %v699_v6  ;;  %v695_v34 = vmul.f32 %v693_v33, %v2689_v11 }
 0x19c   : > { %1055 = vrot.lane.b32.xlu1 %v2692_v29, %s1974_s23  ;;  %1062 = vrot.lane.b32.xlu0 %v2678_v23, %s1975_s28 }
 0x19d   : > { %v705_v28 = vadd.f32 %v703_v31, %v654_v15  ;;  %v1124_v15 = vrot.slane %v2282_v39, 2  ;;  %v557_v31 = vmul.f32 %v555_v4, %v2578_v7 }
 0x19e   : > { %v701_v16 = vpop.permute.xlu1 %700  ;;  %v2702_v42 = vpop.permute.xlu0 %707 }
 0x19f   : > { %v704_v19 = vmul.f32 %v702_v30, %v701_v16  ;;  %v2705_v9 = vadd.f32 %v2287_v41, %v705_v28  ;;  %v556_v30 = vmul.f32 %v555_v4, %v2572_v37  ;;  %v1123_v37 = vrot.slane %v2602_v54, 2 }
 0x1a0   : > { %1064 = vrot.lane.b32.xlu1 %v2692_v29, %s1975_s28  ;;  %1071 = vrot.lane.b32.xlu0 %v2678_v23, %s1976_s13  ;;  %v608_v28 = vmul.f32 %v606_v35, %v2600_v51  ;;  %v694_v16 = vmul.f32 %v693_v33, %v2675_v56  ;;  %v559_v13 = vadd.f32 %v557_v31, %v513_v55  ;;  %v780_v56 = vstv %s2740_s21  ;;  %s2819_s21 = sld [smem:[#allocation8 + $0x1e]] }
 0x1a1   : > { %v706_v38 = vadd.f32 %v704_v19, %v655_v3  ;;  %v558_v24 = vadd.f32 %v556_v30, %v512_v20  ;;  %v2771_v3 = vsel %vm585_vm7, %v1123_v37, %v1124_v15  ;;  %v456_v33 = vstv %s2762_s7  ;;  %s2836_s7 = sld [smem:[#allocation8 + $0x22]] }
 0x1a2   : > { %v2716_v44 = vpop.permute.xlu1 %709  ;;  %v2718_v61 = vpop.permute.xlu0 %716  ;;  %v610_v45 = vadd.f32 %v608_v28, %v559_v13  ;;  %v546_v37 = vstv %s2764_s10  ;;  %v457_v55 = vmul.f32 %v456_v33, %v2508_v57  ;;  %v458_v13 = vmul.f32 %v456_v33, %v2514_v18  ;;  %s2855_s10 = sld [smem:[#allocation8 + $0x26]] }
 0x1a3   : > { %v2721_v41 = vadd.f32 %v2294_v49, %v706_v38  ;;  %v642_v49 = vstv %s2707_s30  ;;  %v609_v58 = vadd.f32 %v607_v25, %v558_v24  ;;  %v493_v24 = vmul.f32 %v492_v36, %v2540_v60  ;;  %s2804_s30 = sld [smem:[#allocation8 + $0x9]] }
 0x1a4   : > { %1073 = vrot.lane.b32.xlu1 %v2692_v29, %s1976_s13  ;;  %1080 = vrot.lane.b32.xlu0 %v2678_v23, %s1977_s8  ;;  %v643_v17 = vmul.f32 %v642_v49, %v2637_v52  ;;  %v644_v51 = vmul.f32 %v642_v49, %v2649_v47  ;;  %v547_v60 = vmul.f32 %v546_v37, %v2564_v0  ;;  %v633_v0 = vstv %s2787_s11  ;;  %s2863_s11 = sld [smem:[#allocation8 + $0x19]] }
 0x1a6   : > { %v2732_v43 = vpop.permute.xlu1 %718  ;;  %v726_v59 = vpop.permute.xlu0 %725  ;;  %v645_v19 = vadd.f32 %v643_v17, %v609_v58  ;;  %v646_v47 = vadd.f32 %v644_v51, %v610_v45  ;;  %v548_v51 = vmul.f32 %v546_v37, %v2570_v5  ;;  %v1200_v45 = vrot.slane %v2602_v54, 3 }
 0x1a7   : > { %v730_v38 = vmul.f32 %v729_v12, %v726_v59  ;;  %v1203_v5 = vrot.slane %v2284_v40, 3  ;;  %v771_v33 = vstv %s2819_s21  ;;  %s2922_s21 = sld [smem:[#allocation8 + $0x24]] }
 0x1a8   : > { %1082 = vrot.lane.b32.xlu1 %v2692_v29, %s1977_s8  ;;  %1089 = vrot.lane.b32.xlu0 %v2678_v23, %s1978_s20  ;;  %v696_v4 = vadd.f32 %v694_v16, %v645_v19  ;;  %v697_v11 = vadd.f32 %v695_v34, %v646_v47  ;;  %v495_v16 = vadd.f32 %v493_v24, %v457_v55  ;;  %v447_v34 = vstv %s2801_s24  ;;  %s2895_s24 = sld [smem:[#allocation8 + $0x25]] }
 0x1a9   : > { %v537_v47 = vstv %s2804_s30  ;;  %v807_v55 = vstv %s2836_s7  ;;  %s2908_s30 = sld [smem:[#allocation8 + $0x20]]  ;;  %s2936_s7 = sld [smem:[#allocation8 + $0x2b]] }
 0x1aa   : > { %v728_v6 = vpop.permute.xlu1 %727  ;;  %v2746_v14 = vpop.permute.xlu0 %758  ;;  %v732_v59 = vadd.f32 %v730_v38, %v696_v4  ;;  %v549_v19 = vadd.f32 %v547_v60, %v495_v16  ;;  %v684_v38 = vstv %s2797_s22  ;;  %v1201_v4 = vrot.slane %v2282_v39, 3  ;;  %s2889_s22 = sld [smem:[#allocation8 + $0x21]] }
 0x1ab   : > { %v731_v49 = vmul.f32 %v729_v12, %v728_v6 }
 0x1ac   : > { %1091 = vrot.lane.b32.xlu1 %v2692_v29, %s1978_s20  ;;  %1098 = vrot.lane.b32.xlu0 %v2678_v23, %s1979_s27  ;;  %v1126_v23 = vrot.slane %v2284_v40, 2  ;;  %v2869_v24 = vsel %vm663_vm2, %v1200_v45, %v1201_v4  ;;  %v624_v40 = vstv %s2826_s2  ;;  %s2934_s2 = sld [smem:[#allocation8 + $0x28]] }
 0x1ad   : > { %v733_v31 = vadd.f32 %v731_v49, %v697_v11  ;;  %v720_v49 = vstv %s2809_s4  ;;  %v593_v11 = vadd.f32 %v2260_v22, %v549_v19  ;;  %v635_v22 = vmul.f32 %v633_v0, %v2635_v21  ;;  %s2915_s4 = sld [smem:[#allocation8 + $0x27]] }
 0x1ae   : > { %v2766_v52 = vpop.permute.xlu1 %760  ;;  %v2768_v7 = vpop.permute.xlu0 %767  ;;  %v2784_v20 = vsel %vm585_vm7, %v1124_v15, %v1126_v23  ;;  %v494_v23 = vmul.f32 %v492_v36, %v2546_v2  ;;  %v483_v2 = vstv %s2793_s12  ;;  %v573_v36 = vstv %s2817_s5  ;;  %s2876_s12 = sld [smem:[#allocation8 + $0x1d]]  ;;  %s2917_s5 = sld [smem:[#allocation8 + $0x29]] }
 0x1af   : > { %v484_v18 = vmul.f32 %v483_v2, %v2532_v48  ;;  %v448_v48 = vmul.f32 %v447_v34, %v2500_v46  ;;  %v485_v46 = vmul.f32 %v483_v2, %v2538_v53  ;;  %v686_v21 = vmul.f32 %v684_v38, %v2673_v8 }
 0x1b0   : > { %1100 = vrot.lane.b32.xlu1 %v2692_v29, %s1979_s27  ;;  %1130 = vrot.lane.b32.xlu0 %v2771_v3, %s1974_s23  ;;  %v449_v53 = vmul.f32 %v447_v34, %v2506_v50  ;;  %v3410_v50 = vld [vmem:[#allocation39_spill] sm:$0xff]  ;;  %v858_v34 = vstv %s2855_s10  ;;  %s2952_s10 = sld [smem:[#allocation8 + $0x2c]] }
 0x1b1   : > { %v575_v45 = vmul.f32 %v573_v36, %v3410_v50 }
 0x1b2   : > { %v2781_v35 = vpop.permute.xlu1 %769  ;;  %v777_v30 = vpop.permute.xlu0 %776 }
 0x1b3   : > { %v781_v29 = vmul.f32 %v780_v56, %v777_v30  ;;  %v496_v30 = vadd.f32 %v494_v23, %v458_v13 }
 0x1b4   : > { %1132 = vrot.lane.b32.xlu1 %v2784_v20, %s1974_s23  ;;  %1139 = vrot.lane.b32.xlu0 %v2771_v3, %s1975_s28 }
 0x1b5   : > { %v783_v25 = vadd.f32 %v781_v29, %v732_v59  ;;  %v634_v59 = vmul.f32 %v633_v0, %v2624_v10  ;;  %v550_v29 = vadd.f32 %v548_v51, %v496_v30  ;;  %v685_v10 = vmul.f32 %v684_v38, %v2662_v1  ;;  %v3409_v0 = vld [vmem:[#allocation40_spill] sm:$0xff] }
 0x1b6   : > { %v779_v15 = vpop.permute.xlu1 %778  ;;  %v2799_v6 = vpop.permute.xlu0 %785  ;;  %v721_v1 = vmul.f32 %v720_v49, %v2718_v61  ;;  %v772_v61 = vmul.f32 %v771_v33, %v2768_v7  ;;  %v625_v13 = vmul.f32 %v624_v40, %v3409_v0  ;;  %v722_v51 = vmul.f32 %v720_v49, %v2732_v43  ;;  %v3411_v49 = vld [vmem:[#allocation41_spill] sm:$0xff] }
 0x1b7   : > { %v782_v17 = vmul.f32 %v780_v56, %v779_v15  ;;  %v2807_v12 = vadd.f32 %v2310_v62, %v783_v25  ;;  %v538_v25 = vmul.f32 %v537_v47, %v2556_v32  ;;  %v574_v32 = vmul.f32 %v573_v36, %v2586_v27  ;;  %v3408_v27 = vld [vmem:[#allocation38_spill] sm:$0xff] }
 0x1b8   : > { %1141 = vrot.lane.b32.xlu1 %v2784_v20, %s1975_s28  ;;  %1148 = vrot.lane.b32.xlu0 %v2771_v3, %s1976_s13  ;;  %v594_v60 = vadd.f32 %v2263_v26, %v550_v29  ;;  %v539_v23 = vmul.f32 %v537_v47, %v3408_v27  ;;  %v487_v7 = vadd.f32 %v485_v46, %v449_v53  ;;  %v711_v36 = vstv %s2863_s11  ;;  %s2962_s11 = sld [smem:[#allocation8 + $0x2d]] }
 0x1b9   : > { %v784_v58 = vadd.f32 %v782_v17, %v733_v31  ;;  %v636_v31 = vadd.f32 %v634_v59, %v593_v11  ;;  %v486_v17 = vadd.f32 %v484_v18, %v448_v48  ;;  %v773_v43 = vmul.f32 %v771_v33, %v2781_v35 }
 0x1ba   : > { %v2821_v62 = vpop.permute.xlu1 %787  ;;  %v2823_v28 = vpop.permute.xlu0 %794  ;;  %v637_v19 = vadd.f32 %v635_v22, %v594_v60  ;;  %v541_v59 = vadd.f32 %v539_v23, %v487_v7  ;;  %v626_v29 = vmul.f32 %v624_v40, %v3411_v49  ;;  %v712_v35 = vmul.f32 %v711_v36, %v2702_v42  ;;  %v3414_v23 = vld [vmem:[#allocation14_spill] sm:$0xff]  ;;  %v3415_v7 = vld [vmem:[#allocation17_spill] sm:$0xff] }
 0x1bb   : > { %v2829_v57 = vadd.f32 %v2313_v63, %v784_v58  ;;  %v687_v58 = vadd.f32 %v685_v10, %v636_v31  ;;  %v540_v16 = vadd.f32 %v538_v25, %v486_v17  ;;  %v798_v17 = vstv %s2889_s22  ;;  %s2986_s22 = sld [smem:[#allocation8 + $0x2f]] }
 0x1bc   : > { %1150 = vrot.lane.b32.xlu1 %v2784_v20, %s1976_s13  ;;  %1157 = vrot.lane.b32.xlu0 %v2771_v3, %s1977_s8  ;;  %v688_v30 = vadd.f32 %v686_v21, %v637_v19  ;;  %v577_v22 = vadd.f32 %v575_v45, %v541_v59  ;;  %v3413_v21 = vld [vmem:[#allocation16_spill] sm:$0xff]  ;;  %v713_v42 = vmul.f32 %v711_v36, %v2716_v44  ;;  %v849_v53 = vstv %s2895_s24  ;;  %s2992_s24 = sld [smem:[#allocation8 + $0x30]] }
 0x1bd   : > { %v723_v26 = vadd.f32 %v721_v1, %v687_v58  ;;  %v576_v38 = vadd.f32 %v574_v32, %v540_v16  ;;  %v762_v1 = vstv %s2876_s12  ;;  %v799_v16 = vmul.f32 %v798_v17, %v2823_v28  ;;  %s2974_s12 = sld [smem:[#allocation8 + $0x2e]] }
 0x1be   : > { %v2842_v63 = vpop.permute.xlu1 %796  ;;  %v804_v56 = vpop.permute.xlu0 %803  ;;  %v628_v33 = vadd.f32 %v626_v29, %v577_v22  ;;  %v764_v44 = vmul.f32 %v762_v1, %v2766_v52  ;;  %v885_v52 = vstv %s2917_s5  ;;  %s3016_s5 = sld [smem:[#allocation8 + $0x34]] }
 0x1bf   : > { %v808_v8 = vmul.f32 %v807_v55, %v804_v56  ;;  %v774_v47 = vadd.f32 %v772_v61, %v723_v26  ;;  %v2904_v56 = vsel %vm663_vm2, %v1201_v4, %v1203_v5  ;;  %v627_v18 = vadd.f32 %v625_v13, %v576_v38 }
 0x1c0   : > { %1159 = vrot.lane.b32.xlu1 %v2784_v20, %s1977_s8  ;;  %1166 = vrot.lane.b32.xlu0 %v2771_v3, %s1978_s20  ;;  %v672_v0 = vadd.f32 %v3414_v23, %v628_v33  ;;  %v800_v45 = vmul.f32 %v798_v17, %v2842_v63 }
 0x1c1   : > { %v810_v48 = vadd.f32 %v808_v8, %v774_v47  ;;  %v840_v47 = vstv %s2922_s21  ;;  %s3018_s21 = sld [smem:[#allocation8 + $0x31]] }
 0x1c2   : > { %v806_v37 = vpop.permute.xlu1 %805  ;;  %v2866_v15 = vpop.permute.xlu0 %836  ;;  %v715_v50 = vadd.f32 %v713_v42, %v672_v0 }
 0x1c3   : > { %v809_v25 = vmul.f32 %v807_v55, %v806_v37  ;;  %v3412_v37 = vld [vmem:[#allocation13_spill] sm:$0xff]  ;;  %v763_v55 = vmul.f32 %v762_v1, %v2746_v14 }
 0x1c4   : > { %1168 = vrot.lane.b32.xlu1 %v2784_v20, %s1978_s20  ;;  %1175 = vrot.lane.b32.xlu0 %v2771_v3, %s1979_s27  ;;  %v671_v40 = vadd.f32 %v3412_v37, %v627_v18 }
 0x1c6   : > { %v2891_v2 = vpop.permute.xlu1 %838  ;;  %v846_v3 = vpop.permute.xlu0 %845  ;;  %v714_v14 = vadd.f32 %v712_v35, %v671_v40 }
 0x1c7   : > { %v850_v8 = vmul.f32 %v849_v53, %v846_v3  ;;  %v766_v3 = vadd.f32 %v764_v44, %v715_v50 }
 0x1c8   : > { %1177 = vrot.lane.b32.xlu1 %v2784_v20, %s1979_s27  ;;  %1207 = vrot.lane.b32.xlu0 %v2869_v24, %s1974_s23  ;;  %v724_v20 = vadd.f32 %v722_v51, %v688_v30  ;;  %v765_v26 = vadd.f32 %v763_v55, %v714_v14  ;;  %v789_v51 = vstv %s2908_s30  ;;  %s3000_s30 = sld [smem:[#allocation8 + $0x32]] }
 0x1c9   : > { %v790_v30 = vmul.f32 %v789_v51, %v2799_v6  ;;  %v802_v36 = vadd.f32 %v800_v45, %v766_v3  ;;  %v841_v6 = vmul.f32 %v840_v47, %v2866_v15  ;;  %v927_v15 = vstv %s2952_s10  ;;  %s3043_s10 = sld [smem:[#allocation8 + $0x37]] }
 0x1ca   : > { %v848_v11 = vpop.permute.xlu1 %847  ;;  %v855_v10 = vpop.permute.xlu0 %854  ;;  %v775_v4 = vadd.f32 %v773_v43, %v724_v20  ;;  %v801_v28 = vadd.f32 %v799_v16, %v765_v26  ;;  %v918_v20 = vstv %s2936_s7  ;;  %s3036_s7 = sld [smem:[#allocation8 + $0x36]] }
 0x1cb   : > { %v859_v31 = vmul.f32 %v858_v34, %v855_v10  ;;  %v851_v43 = vmul.f32 %v849_v53, %v848_v11  ;;  %v876_v10 = vstv %s2934_s2  ;;  %s3025_s2 = sld [smem:[#allocation8 + $0x35]] }
 0x1cc   : > { %1209 = vrot.lane.b32.xlu1 %v2904_v56, %s1974_s23  ;;  %1216 = vrot.lane.b32.xlu0 %v2869_v24, %s1975_s28  ;;  %v811_v60 = vadd.f32 %v809_v25, %v775_v4  ;;  %v852_v18 = vadd.f32 %v850_v8, %v801_v28  ;;  %v792_v25 = vadd.f32 %v790_v30, %v2705_v9 }
 0x1cd   : > { %v861_v5 = vadd.f32 %v859_v31, %v810_v48  ;;  %v1277_v48 = vrot.slane %v2602_v54, 4  ;;  %v791_v31 = vmul.f32 %v789_v51, %v2821_v62  ;;  %v853_v22 = vadd.f32 %v851_v43, %v802_v36 }
 0x1ce   : > { %v857_v46 = vpop.permute.xlu1 %856  ;;  %v864_v32 = vpop.permute.xlu0 %863  ;;  %v843_v9 = vadd.f32 %v841_v6, %v792_v25  ;;  %v842_v62 = vmul.f32 %v840_v47, %v2891_v2  ;;  %v936_v2 = vstv %s2962_s11  ;;  %s3056_s11 = sld [smem:[#allocation8 + $0x39]] }
 0x1cf   : > { %v860_v58 = vmul.f32 %v858_v34, %v857_v46  ;;  %v2926_v61 = vadd.f32 %v3413_v21, %v861_v5  ;;  %v867_v34 = vstv %s2915_s4  ;;  %s3009_s4 = sld [smem:[#allocation8 + $0x33]] }
 0x1d0   : > { %1218 = vrot.lane.b32.xlu1 %v2904_v56, %s1975_s28  ;;  %1225 = vrot.lane.b32.xlu0 %v2869_v24, %s1976_s13  ;;  %v868_v49 = vmul.f32 %v867_v34, %v864_v32 }
 0x1d1   : > { %v862_v27 = vadd.f32 %v860_v58, %v811_v60  ;;  %v3416_v58 = vrot.slane %v2282_v39, 4 }
 0x1d2   : > { %v866_v13 = vpop.permute.xlu1 %865  ;;  %v873_v19 = vpop.permute.xlu0 %872  ;;  %v870_v5 = vadd.f32 %v868_v49, %v2807_v12  ;;  %v793_v12 = vadd.f32 %v791_v31, %v2721_v41  ;;  %v1354_v31 = vrot.slane %v2602_v54, 5 }
 0x1d3   : > { %v2943_v38 = vadd.f32 %v3415_v7, %v862_v27  ;;  %v869_v1 = vmul.f32 %v867_v34, %v866_v13  ;;  %v877_v33 = vmul.f32 %v876_v10, %v873_v19  ;;  %v1279_v21 = vsel %vm741_vm3, %v1277_v48, %v3416_v58  ;;  %v3417_v19 = vld [vmem:[#allocation15_spill] sm:$0xff] }
 0x1d4   : > { %1227 = vrot.lane.b32.xlu1 %v2904_v56, %s1976_s13  ;;  %1234 = vrot.lane.b32.xlu0 %v2869_v24, %s1977_s8  ;;  %v844_v41 = vadd.f32 %v842_v62, %v793_v12  ;;  %v954_v34 = vstv %s2986_s22  ;;  %s3072_s22 = sld [smem:[#allocation8 + $0x3b]] }
 0x1d5   : > { %v871_v32 = vadd.f32 %v869_v1, %v2829_v57 }
 0x1d6   : > { %v875_v59 = vpop.permute.xlu1 %874  ;;  %v882_v63 = vpop.permute.xlu0 %881 }
 0x1d7   : > { %v886_v29 = vmul.f32 %v885_v52, %v882_v63  ;;  %v878_v42 = vmul.f32 %v876_v10, %v875_v59  ;;  %v963_v59 = vstv %s2992_s24  ;;  %v977_v10 = vstv %s3000_s30  ;;  %s3079_s24 = sld [smem:[#allocation8 + $0x3c]]  ;;  %s3090_s30 = sld [smem:[#allocation8 + $0x3d]] }
 0x1d8   : > { %1236 = vrot.lane.b32.xlu1 %v2904_v56, %s1977_s8  ;;  %1243 = vrot.lane.b32.xlu0 %v2869_v24, %s1978_s20 }
 0x1d9   : > { %v888_v11 = vadd.f32 %v886_v29, %v852_v18  ;;  %v880_v0 = vadd.f32 %v878_v42, %v844_v41  ;;  %v3420_v42 = vld [vmem:[#allocation18_spill] sm:$0xff] }
 0x1da   : > { %v884_v35 = vpop.permute.xlu1 %883  ;;  %v915_v4 = vpop.permute.xlu0 %914 }
 0x1db   : > { %v887_v37 = vmul.f32 %v885_v52, %v884_v35  ;;  %v919_v40 = vmul.f32 %v918_v20, %v915_v4 }
 0x1dc   : > { %1245 = vrot.lane.b32.xlu1 %v2904_v56, %s1978_s20  ;;  %1252 = vrot.lane.b32.xlu0 %v2869_v24, %s1979_s27  ;;  %v879_v24 = vadd.f32 %v877_v33, %v843_v9  ;;  %v3418_v33 = vld [vmem:[#allocation19_spill] sm:$0xff]  ;;  %v3419_v9 = vrot.slane %v2282_v39, 5 }
 0x1dd   : > { %v889_v17 = vadd.f32 %v887_v37, %v853_v22  ;;  %v921_v46 = vadd.f32 %v919_v40, %v870_v5  ;;  %v986_v22 = vstv %s3009_s4  ;;  %v1028_v37 = vmul.f32 %v3418_v33, %v2602_v54  ;;  %s3096_s4 = sld [smem:[#allocation8 + $0x3e]] }
 0x1de   : > { %v917_v55 = vpop.permute.xlu1 %916  ;;  %v924_v60 = vpop.permute.xlu0 %923  ;;  %v1356_v62 = vsel %vm819_vm4, %v1354_v31, %v3419_v9 }
 0x1df   : > { %v920_v53 = vmul.f32 %v918_v20, %v917_v55  ;;  %v928_v14 = vmul.f32 %v927_v15, %v924_v60  ;;  %v968_v60 = vstv %s3018_s21  ;;  %v1034_v58 = vrot.slane %v1028_v37, 1  ;;  %s3153_s21 = sld [smem:[#allocation8 + $0x48]] }
 0x1e0   : > { %1254 = vrot.lane.b32.xlu1 %v2904_v56, %s1979_s27  ;;  %1284 = vrot.lane.b32.xlu0 %v1279_v21, %s1974_s23  ;;  %v945_v56 = vstv %s2974_s12  ;;  %v969_v41 = vmul.f32 %v968_v60, %v2602_v54  ;;  %s3066_s12 = sld [smem:[#allocation8 + $0x3a]] }
 0x1e1   : > { %v922_v57 = vadd.f32 %v920_v53, %v871_v32  ;;  %v930_v16 = vadd.f32 %v928_v14, %v879_v24  ;;  %v1004_v53 = vstv %s3025_s2  ;;  %s3157_s2 = sld [smem:[#allocation8 + $0x49]] }
 0x1e2   : > { %v926_v27 = vpop.permute.xlu1 %925  ;;  %v933_v23 = vpop.permute.xlu0 %932 }
 0x1e3   : > { %v929_v44 = vmul.f32 %v927_v15, %v926_v27  ;;  %v937_v13 = vmul.f32 %v936_v2, %v933_v23  ;;  %v3421_v27 = vld [vmem:[#allocation20_spill] sm:$0xff] }
 0x1e4   : > { %1286 = vrot.lane.b32.xlu1 %v3417_v19, %s1974_s23  ;;  %1293 = vrot.lane.b32.xlu0 %v1279_v21, %s1975_s28  ;;  %v3422_v23 = vrot.slane %v3421_v27, 1 }
 0x1e5   : > { %v931_v26 = vadd.f32 %v929_v44, %v880_v0  ;;  %v2994_v51 = vadd.f32 %v937_v13, %v888_v11 }
 0x1e6   : > { %v935_v8 = vpop.permute.xlu1 %934  ;;  %v942_v7 = vpop.permute.xlu0 %941  ;;  %v1036_v0 = vsel %vm504_vm6, %v1034_v58, %v3422_v23  ;;  %v1066_v31 = vstv %s3066_s12  ;;  %v1084_v58 = vstv %s3079_s24  ;;  %v1093_v23 = vstv %s3090_s30  ;;  %s1713_s12 = sld [smem:[#allocation8 + $0x50]]  ;;  %s1716_s24 = sld [smem:[#allocation8 + $0x53]] }
 0x1e7   : > { %v938_v50 = vmul.f32 %v936_v2, %v935_v8  ;;  %v946_v45 = vmul.f32 %v945_v56, %v942_v7  ;;  %v971_v13 = vadd.f32 %v969_v41, %v2994_v51  ;;  %s1720_s30 = sld [smem:[#allocation8 + $0x57]] }
 0x1e8   : > { %1295 = vrot.lane.b32.xlu1 %v3417_v19, %s1975_s28  ;;  %1302 = vrot.lane.b32.xlu0 %v1279_v21, %s1976_s13 }
 0x1e9   : > { %v3002_v52 = vadd.f32 %v938_v50, %v889_v17  ;;  %v948_v28 = vadd.f32 %v946_v45, %v2926_v61  ;;  %v995_v17 = vstv %s3016_s5  ;;  %v1833_v50 = vld [vmem:[#allocation2 + $0x20] sm:$0xff]  ;;  %s3130_s5 = sld [smem:[#allocation8 + $0x43]] }
 0x1ea   : > { %v944_v3 = vpop.permute.xlu1 %943  ;;  %v951_v30 = vpop.permute.xlu0 %950  ;;  %v970_v45 = vmul.f32 %v1833_v50, %v968_v60 }
 0x1eb   : > { %v947_v47 = vmul.f32 %v945_v56, %v944_v3  ;;  %v955_v43 = vmul.f32 %v954_v34, %v951_v30 }
 0x1ec   : > { %1304 = vrot.lane.b32.xlu1 %v3417_v19, %s1976_s13  ;;  %1311 = vrot.lane.b32.xlu0 %v1279_v21, %s1977_s8  ;;  %v972_v51 = vadd.f32 %v970_v45, %v3002_v52  ;;  %v1102_v45 = vstv %s3096_s4  ;;  %s1711_s4 = sld [smem:[#allocation8 + $0x4e]] }
 0x1ed   : > { %v949_v63 = vadd.f32 %v947_v47, %v2943_v38  ;;  %v957_v18 = vadd.f32 %v955_v43, %v921_v46  ;;  %v3423_v47 = vld [vmem:[#allocation26_spill] sm:$0xff] }
 0x1ee   : > { %v953_v49 = vpop.permute.xlu1 %952  ;;  %v960_v29 = vpop.permute.xlu0 %959 }
 0x1ef   : > { %v956_v36 = vmul.f32 %v954_v34, %v953_v49  ;;  %v964_v61 = vmul.f32 %v963_v59, %v960_v29 }
 0x1f0   : > { %1313 = vrot.lane.b32.xlu1 %v3417_v19, %s1977_s8  ;;  %1320 = vrot.lane.b32.xlu0 %v1279_v21, %s1978_s20 }
 0x1f1   : > { %v958_v20 = vadd.f32 %v956_v36, %v922_v57  ;;  %v966_v6 = vadd.f32 %v964_v61, %v930_v16  ;;  %v1057_v61 = vstv %s3056_s11  ;;  %s1709_s11 = sld [smem:[#allocation8 + $0x4c]] }
 0x1f2   : > { %v962_v11 = vpop.permute.xlu1 %961  ;;  %v974_v48 = vpop.permute.xlu0 %973 }
 0x1f3   : > { %v965_v38 = vmul.f32 %v963_v59, %v962_v11  ;;  %v978_v25 = vmul.f32 %v977_v10, %v974_v48  ;;  %v1022_v59 = vstv %s3043_s10  ;;  %s1708_s10 = sld [smem:[#allocation8 + $0x4b]] }
 0x1f4   : > { %1322 = vrot.lane.b32.xlu1 %v3417_v19, %s1978_s20  ;;  %1329 = vrot.lane.b32.xlu0 %v1279_v21, %s1979_s27 }
 0x1f5   : > { %v967_v1 = vadd.f32 %v965_v38, %v931_v26  ;;  %v980_v35 = vadd.f32 %v978_v25, %v948_v28  ;;  %v1013_v26 = vstv %s3036_s7  ;;  %v1431_v25 = vrot.slane %v2602_v54, 6  ;;  %s3160_s7 = sld [smem:[#allocation8 + $0x4a]] }
 0x1f6   : > { %v976_v4 = vpop.permute.xlu1 %975  ;;  %v983_v5 = vpop.permute.xlu0 %982 }
 0x1f7   : > { %v979_v40 = vmul.f32 %v977_v10, %v976_v4  ;;  %v987_v15 = vmul.f32 %v986_v22, %v983_v5  ;;  %v3424_v5 = vld [vmem:[#allocation22_spill] sm:$0xff] }
 0x1f8   : > { %1331 = vrot.lane.b32.xlu1 %v3417_v19, %s1979_s27  ;;  %1361 = vrot.lane.b32.xlu0 %v1356_v62, %s1974_s23  ;;  %v1108_v33 = vmul.f32 %v3424_v5, %v2602_v54 }
 0x1f9   : > { %v981_v46 = vadd.f32 %v979_v40, %v949_v63  ;;  %v989_v12 = vadd.f32 %v987_v15, %v957_v18  ;;  %v3425_v15 = vrot.slane %v2282_v39, 6  ;;  %v3426_v39 = vld [vmem:[#allocation21_spill] sm:$0xff] }
 0x1fa   : > { %v985_v32 = vpop.permute.xlu1 %984  ;;  %v992_v55 = vpop.permute.xlu0 %991  ;;  %v1114_v54 = vrot.slane %v1108_v33, 2 }
 0x1fb   : > { %v988_v21 = vmul.f32 %v986_v22, %v985_v32  ;;  %v996_v24 = vmul.f32 %v995_v17, %v992_v55  ;;  %v1433_v9 = vsel %vm897_vm5, %v1431_v25, %v3425_v15 }
 0x1fc   : > { %1363 = vrot.lane.b32.xlu1 %v3420_v42, %s1974_s23  ;;  %1370 = vrot.lane.b32.xlu0 %v1356_v62, %s1975_s28 }
 0x1fd   : > { %v990_v14 = vadd.f32 %v988_v21, %v958_v20  ;;  %v998_v2 = vadd.f32 %v996_v24, %v966_v6 }
 0x1fe   : > { %v994_v57 = vpop.permute.xlu1 %993  ;;  %v1001_v16 = vpop.permute.xlu0 %1000 }
 0x1ff   : > { %v997_v44 = vmul.f32 %v995_v17, %v994_v57  ;;  %v1005_v19 = vmul.f32 %v1004_v53, %v1001_v16  ;;  %v3050_v56 = vadd.f32 %v1036_v0, %v998_v2 }
 0x200   : > { %1372 = vrot.lane.b32.xlu1 %v3420_v42, %s1975_s28  ;;  %1379 = vrot.lane.b32.xlu0 %v1356_v62, %s1976_s13 }
 0x201   : > { %v999_v8 = vadd.f32 %v997_v44, %v967_v1  ;;  %v1007_v7 = vadd.f32 %v1005_v19, %v971_v13 }
 0x202   : > { %v1003_v34 = vpop.permute.xlu1 %1002  ;;  %v1010_v28 = vpop.permute.xlu0 %1009 }
 0x203   : > { %v1006_v3 = vmul.f32 %v1004_v53, %v1003_v34  ;;  %v1014_v30 = vmul.f32 %v1013_v26, %v1010_v28  ;;  %v3060_v43 = vadd.f32 %v3423_v47, %v999_v8 }
 0x204   : > { %1381 = vrot.lane.b32.xlu1 %v3420_v42, %s1976_s13  ;;  %1388 = vrot.lane.b32.xlu0 %v1356_v62, %s1977_s8 }
 0x205   : > { %v1008_v63 = vadd.f32 %v1006_v3, %v972_v51  ;;  %v1016_v18 = vadd.f32 %v1014_v30, %v980_v35 }
 0x206   : > { %v1012_v49 = vpop.permute.xlu1 %1011  ;;  %v1019_v29 = vpop.permute.xlu0 %1018 }
 0x207   : > { %v1015_v52 = vmul.f32 %v1013_v26, %v1012_v49  ;;  %v1023_v36 = vmul.f32 %v1022_v59, %v1019_v29 }
 0x208   : > { %1390 = vrot.lane.b32.xlu1 %v3420_v42, %s1977_s8  ;;  %1397 = vrot.lane.b32.xlu0 %v1356_v62, %s1978_s20 }
 0x209   : > { %v1017_v10 = vadd.f32 %v1015_v52, %v981_v46  ;;  %v1025_v20 = vadd.f32 %v1023_v36, %v989_v12 }
 0x20a   : > { %v1021_v6 = vpop.permute.xlu1 %1020  ;;  %v1054_v11 = vpop.permute.xlu0 %1053 }
 0x20b   : > { %v1024_v48 = vmul.f32 %v1022_v59, %v1021_v6  ;;  %v1058_v38 = vmul.f32 %v1057_v61, %v1054_v11  ;;  %v3132_v6 = vld [vmem:[#allocation2 + $0x18] sm:$0xff]  ;;  %v3430_v11 = vld [vmem:[#allocation23_spill] sm:$0xff] }
 0x20c   : > { %1399 = vrot.lane.b32.xlu1 %v3420_v42, %s1978_s20  ;;  %1406 = vrot.lane.b32.xlu0 %v1356_v62, %s1979_s27  ;;  %v1075_v62 = vstv %s3072_s22  ;;  %s1712_s22 = sld [smem:[#allocation8 + $0x4f]] }
 0x20d   : > { %v1026_v22 = vadd.f32 %v1024_v48, %v990_v14  ;;  %v1060_v1 = vadd.f32 %v1058_v38, %v1007_v7  ;;  %v3427_v14 = vld [vmem:[#allocation24_spill] sm:$0xff]  ;;  %v3429_v7 = vld [vmem:[#allocation29_spill] sm:$0xff]  ;;  %v1185_v48 = vmul.f32 %v3132_v6, %v3430_v11  ;;  %v1238_v11 = vstv %s3160_s7  ;;  %s3238_s7 = sld [smem:[#allocation8 + $0x5c]] }
 0x20e   : > { %v1056_v35 = vpop.permute.xlu1 %1055  ;;  %v1063_v4 = vpop.permute.xlu0 %1062  ;;  %v3428_v2 = vrot.slane %v3427_v14, 2 }
 0x20f   : > { %v1059_v37 = vmul.f32 %v1057_v61, %v1056_v35  ;;  %v1067_v40 = vmul.f32 %v1066_v31, %v1063_v4  ;;  %v1191_v5 = vrot.slane %v1185_v48, 3 }
 0x210   : > { %1408 = vrot.lane.b32.xlu1 %v3420_v42, %s1979_s27  ;;  %1438 = vrot.lane.b32.xlu0 %v1433_v9, %s1974_s23  ;;  %v1116_v41 = vsel %vm585_vm7, %v1114_v54, %v3428_v2  ;;  %v3433_v2 = vld [vmem:[#allocation33_spill] sm:$0xff] }
 0x211   : > { %v1061_v17 = vadd.f32 %v1059_v37, %v1008_v63  ;;  %v1069_v46 = vadd.f32 %v1067_v40, %v1016_v18  ;;  %v1161_v40 = vstv %s3130_s5  ;;  %s3224_s5 = sld [smem:[#allocation8 + $0x51]] }
 0x212   : > { %v1065_v12 = vpop.permute.xlu1 %1064  ;;  %v1072_v32 = vpop.permute.xlu0 %1071 }
 0x213   : > { %v1068_v55 = vmul.f32 %v1066_v31, %v1065_v12  ;;  %v1076_v60 = vmul.f32 %v1075_v62, %v1072_v32 }
 0x214   : > { %1440 = vrot.lane.b32.xlu1 %v3426_v39, %s1974_s23  ;;  %1447 = vrot.lane.b32.xlu0 %v1433_v9, %s1975_s28  ;;  %s3107_s23 = sld [smem:[#allocation8 + $0x40]] }
 0x215   : > { %v1070_v21 = vadd.f32 %v1068_v55, %v1017_v10  ;;  %v1078_v24 = vadd.f32 %v1076_v60, %v1025_v20 }
 0x216   : > { %v1074_v42 = vpop.permute.xlu1 %1073  ;;  %v1081_v53 = vpop.permute.xlu0 %1080 }
 0x217   : > { %v1077_v57 = vmul.f32 %v1075_v62, %v1074_v42  ;;  %v1085_v16 = vmul.f32 %v1084_v58, %v1081_v53  ;;  %v3101_v27 = vadd.f32 %v1116_v41, %v1078_v24 }
 0x218   : > { %1449 = vrot.lane.b32.xlu1 %v3426_v39, %s1975_s28  ;;  %1456 = vrot.lane.b32.xlu0 %v1433_v9, %s1976_s13  ;;  %s3117_s28 = sld [smem:[#allocation8 + $0x41]] }
 0x219   : > { %v1079_v0 = vadd.f32 %v1077_v57, %v1026_v22  ;;  %v1087_v44 = vadd.f32 %v1085_v16, %v3050_v56 }
 0x21a   : > { %v1083_v13 = vpop.permute.xlu1 %1082  ;;  %v1090_v19 = vpop.permute.xlu0 %1089  ;;  %v1134_v47 = vstv %s3107_s23  ;;  %s3216_s23 = sld [smem:[#allocation8 + $0x52]] }
 0x21b   : > { %v1086_v26 = vmul.f32 %v1084_v58, %v1083_v13  ;;  %v1094_v8 = vmul.f32 %v1093_v23, %v1090_v19  ;;  %v3111_v50 = vadd.f32 %v3429_v7, %v1079_v0 }
 0x21c   : > { %1458 = vrot.lane.b32.xlu1 %v3426_v39, %s1976_s13  ;;  %1465 = vrot.lane.b32.xlu0 %v1433_v9, %s1977_s8  ;;  %s3124_s13 = sld [smem:[#allocation8 + $0x42]] }
 0x21d   : > { %v1088_v34 = vadd.f32 %v1086_v26, %v3060_v43  ;;  %v1096_v28 = vadd.f32 %v1094_v8, %v1060_v1 }
 0x21e   : > { %v1092_v56 = vpop.permute.xlu1 %1091  ;;  %v1099_v51 = vpop.permute.xlu0 %1098  ;;  %v1143_v52 = vstv %s3117_s28  ;;  %s3218_s28 = sld [smem:[#allocation8 + $0x56]] }
 0x21f   : > { %v1095_v3 = vmul.f32 %v1093_v23, %v1092_v56  ;;  %v1103_v30 = vmul.f32 %v1102_v45, %v1099_v51  ;;  %v1220_v56 = vstv %s3153_s21  ;;  %s3233_s21 = sld [smem:[#allocation8 + $0x59]] }
 0x220   : > { %1467 = vrot.lane.b32.xlu1 %v3426_v39, %s1977_s8  ;;  %1474 = vrot.lane.b32.xlu0 %v1433_v9, %s1978_s20  ;;  %s3139_s8 = sld [smem:[#allocation8 + $0x44]] }
 0x221   : > { %v1097_v59 = vadd.f32 %v1095_v3, %v1061_v17  ;;  %v1105_v63 = vadd.f32 %v1103_v30, %v1069_v46  ;;  %v3431_v46 = vld [vmem:[#allocation25_spill] sm:$0xff] }
 0x222   : > { %v1101_v18 = vpop.permute.xlu1 %1100  ;;  %v1131_v49 = vpop.permute.xlu0 %1130  ;;  %v1152_v31 = vstv %s3124_s13  ;;  %v3432_v12 = vrot.slane %v3431_v46, 3  ;;  %s3222_s13 = sld [smem:[#allocation8 + $0x5a]] }
 0x223   : > { %v1104_v43 = vmul.f32 %v1102_v45, %v1101_v18  ;;  %v1135_v29 = vmul.f32 %v1134_v47, %v1131_v49  ;;  %v1229_v49 = vstv %s3157_s2  ;;  %s3235_s2 = sld [smem:[#allocation8 + $0x5f]] }
 0x224   : > { %1476 = vrot.lane.b32.xlu1 %v3426_v39, %s1978_s20  ;;  %1483 = vrot.lane.b32.xlu0 %v1433_v9, %s1979_s27  ;;  %s3142_s20 = sld [smem:[#allocation8 + $0x45]]  ;;  %v1193_v32 = vsel %vm663_vm2, %v1191_v5, %v3432_v12  ;;  %v3437_v12 = vld [vmem:[#allocation35_spill] sm:$0xff] }
 0x225   : > { %v1106_v36 = vadd.f32 %v1104_v43, %v1070_v21  ;;  %v1137_v61 = vadd.f32 %v1135_v29, %v1087_v44 }
 0x226   : > { %v1133_v10 = vpop.permute.xlu1 %1132  ;;  %v1140_v20 = vpop.permute.xlu0 %1139 }
 0x227   : > { %v1136_v38 = vmul.f32 %v1134_v47, %v1133_v10  ;;  %v1144_v25 = vmul.f32 %v1143_v52, %v1140_v20  ;;  %v3434_v47 = vld [vmem:[#allocation27_spill] sm:$0xff] }
 0x228   : > { %1485 = vrot.lane.b32.xlu1 %v3426_v39, %s1979_s27  ;;  %v1170_v39 = vstv %s3139_s8  ;;  %s3148_s27 = sld [smem:[#allocation8 + $0x47]]  ;;  %s3226_s8 = sld [smem:[#allocation8 + $0x5e]] }
 0x229   : > { %v1138_v22 = vadd.f32 %v1136_v38, %v1088_v34  ;;  %v1146_v1 = vadd.f32 %v1144_v25, %v1096_v28 }
 0x22a   : > { %v1142_v35 = vpop.permute.xlu1 %1141  ;;  %v1149_v4 = vpop.permute.xlu0 %1148  ;;  %v1179_v57 = vstv %s3142_s20  ;;  %s3228_s20 = sld [smem:[#allocation8 + $0x55]] }
 0x22b   : > { %v1145_v33 = vmul.f32 %v1143_v52, %v1142_v35  ;;  %v1153_v37 = vmul.f32 %v1152_v31, %v1149_v4 }
 0x22d   : > { %v1147_v15 = vadd.f32 %v1145_v33, %v1097_v59  ;;  %v1155_v9 = vadd.f32 %v1153_v37, %v1105_v63  ;;  %v1262_v59 = vmul.f32 %v3132_v6, %v3434_v47  ;;  %v1247_v37 = vstv %s1708_s10  ;;  %s3243_s10 = sld [smem:[#allocation8 + $0x5d]] }
 0x22e   : > { %v1151_v62 = vpop.permute.xlu1 %1150  ;;  %v1158_v17 = vpop.permute.xlu0 %1157  ;;  %v1211_v26 = vstv %s3148_s27  ;;  %s3230_s27 = sld [smem:[#allocation8 + $0x58]] }
 0x22f   : > { %v1154_v54 = vmul.f32 %v1152_v31, %v1151_v62  ;;  %v1162_v55 = vmul.f32 %v1161_v40, %v1158_v17  ;;  %v1198_v60 = vadd.f32 %v1193_v32, %v1155_v9 }
 0x231   : > { %v1156_v58 = vadd.f32 %v1154_v54, %v1106_v36  ;;  %v1164_v21 = vadd.f32 %v1162_v55, %v3101_v27 }
 0x232   : > { %v1160_v24 = vpop.permute.xlu1 %1159  ;;  %v1167_v42 = vpop.permute.xlu0 %1166 }
 0x233   : > { %v1163_v53 = vmul.f32 %v1161_v40, %v1160_v24  ;;  %v1171_v14 = vmul.f32 %v1170_v39, %v1167_v42  ;;  %v1199_v41 = vadd.f32 %v3433_v2, %v1156_v58 }
 0x235   : > { %v1165_v16 = vadd.f32 %v1163_v53, %v3111_v50  ;;  %v1173_v23 = vadd.f32 %v1171_v14, %v1137_v61  ;;  %v1268_v61 = vrot.slane %v1262_v59, 4 }
 0x236   : > { %v1169_v0 = vpop.permute.xlu1 %1168  ;;  %v1176_v44 = vpop.permute.xlu0 %1175 }
 0x237   : > { %v1172_v13 = vmul.f32 %v1170_v39, %v1169_v0  ;;  %v1180_v19 = vmul.f32 %v1179_v57, %v1176_v44  ;;  %v1306_v0 = vstv %s1713_s12  ;;  %s3252_s12 = sld [smem:[#allocation8 + $0x61]] }
 0x239   : > { %v1174_v27 = vadd.f32 %v1172_v13, %v1138_v22  ;;  %v1182_v8 = vadd.f32 %v1180_v19, %v1146_v1  ;;  %v3435_v22 = vld [vmem:[#allocation30_spill] sm:$0xff] }
 0x23a   : > { %v1178_v7 = vpop.permute.xlu1 %1177  ;;  %v1208_v45 = vpop.permute.xlu0 %1207  ;;  %v3436_v1 = vrot.slane %v3435_v22, 4 }
 0x23b   : > { %v1181_v34 = vmul.f32 %v1179_v57, %v1178_v7  ;;  %v1212_v28 = vmul.f32 %v1211_v26, %v1208_v45  ;;  %v3438_v57 = vld [vmem:[#allocation28_spill] sm:$0xff] }
 0x23c   : > { %v1270_v35 = vsel %vm741_vm3, %v1268_v61, %v3436_v1  ;;  %v1333_v61 = vstv %s1716_s24  ;;  %s1739_s24 = sshll.u32 %s1958_s17, 8 }
 0x23d   : > { %v1183_v51 = vadd.f32 %v1181_v34, %v1147_v15  ;;  %v1214_v50 = vadd.f32 %v1212_v28, %v1164_v21  ;;  %v3439_v34 = vld [vmem:[#allocation32_spill] sm:$0xff] }
 0x23e   : > { %v1210_v3 = vpop.permute.xlu1 %1209  ;;  %v1217_v30 = vpop.permute.xlu0 %1216  ;;  %v3440_v28 = vrot.slane %v3439_v34, 5 }
 0x23f   : > { %v1213_v63 = vmul.f32 %v1211_v26, %v1210_v3  ;;  %v1221_v18 = vmul.f32 %v1220_v56, %v1217_v30 }
 0x241   : > { %v1215_v43 = vadd.f32 %v1213_v63, %v1165_v16  ;;  %v1223_v29 = vadd.f32 %v1221_v18, %v1173_v23  ;;  %v1339_v16 = vmul.f32 %v3132_v6, %v3438_v57  ;;  %v3441_v63 = vld [vmem:[#allocation36_spill] sm:$0xff] }
 0x242   : > { %v1219_v52 = vpop.permute.xlu1 %1218  ;;  %v1226_v36 = vpop.permute.xlu0 %1225 }
 0x243   : > { %v1222_v10 = vmul.f32 %v1220_v56, %v1219_v52  ;;  %v1230_v20 = vmul.f32 %v1229_v49, %v1226_v36  ;;  %v1345_v13 = vrot.slane %v1339_v16, 5  ;;  %v3445_v16 = vld [vmem:[#allocation37_spill] sm:$0xff] }
 0x245   : > { %v1224_v48 = vadd.f32 %v1222_v10, %v1174_v27  ;;  %v1232_v38 = vadd.f32 %v1230_v20, %v1182_v8  ;;  %v1347_v56 = vsel %vm819_vm4, %v1345_v13, %v3440_v28  ;;  %v1410_v28 = vstv %s3222_s13  ;;  %s3284_s13 = scalar_lea.hbm %s3339_s3, %s1739_s24 }
 0x246   : > { %v1228_v25 = vpop.permute.xlu1 %1227  ;;  %v1235_v31 = vpop.permute.xlu0 %1234 }
 0x247   : > { %v1231_v4 = vmul.f32 %v1229_v49, %v1228_v25  ;;  %v1239_v5 = vmul.f32 %v1238_v11, %v1235_v31  ;;  %v3169_v33 = vadd.f32 %v1270_v35, %v1232_v38  ;;  %v1383_v31 = vstv %s1720_s30 }
 0x249   : > { %v1233_v40 = vadd.f32 %v1231_v4, %v1183_v51  ;;  %v3171_v15 = vadd.f32 %v1239_v5, %v1198_v60  ;;  %v1256_v60 = vstv %s1709_s11  ;;  %s3245_s11 = sld [smem:[#allocation8 + $0x60]] }
 0x24a   : > { %v1237_v9 = vpop.permute.xlu1 %1236  ;;  %v1244_v62 = vpop.permute.xlu0 %1243 }
 0x24b   : > { %v1240_v17 = vmul.f32 %v1238_v11, %v1237_v9  ;;  %v1248_v46 = vmul.f32 %v1247_v37, %v1244_v62  ;;  %v3174_v32 = vadd.f32 %v3437_v12, %v1233_v40 }
 0x24d   : > { %v3176_v54 = vadd.f32 %v1240_v17, %v1199_v41  ;;  %v1250_v55 = vadd.f32 %v1248_v46, %v1214_v50 }
 0x24e   : > { %v1246_v39 = vpop.permute.xlu1 %1245  ;;  %v1253_v58 = vpop.permute.xlu0 %1252 }
 0x24f   : > { %v1249_v21 = vmul.f32 %v1247_v37, %v1246_v39  ;;  %v1257_v23 = vmul.f32 %v1256_v60, %v1253_v58  ;;  %v3443_v39 = vld [vmem:[#allocation34_spill] sm:$0xff] }
 0x250   : > { %v3444_v58 = vrot.slane %v3443_v39, 6 }
 0x251   : > { %v1251_v24 = vadd.f32 %v1249_v21, %v1215_v43  ;;  %v1259_v19 = vadd.f32 %v1257_v23, %v1223_v29  ;;  %v1297_v29 = vstv %s1712_s22  ;;  %s1633_s22 = sshll.u32 %s2151_s9, 4 }
 0x252   : > { %v1255_v42 = vpop.permute.xlu1 %1254  ;;  %v3178_v53 = vpop.permute.xlu0 %1284  ;;  %s220_s30 = scalar_lea.vmem [#allocation9], %s1633_s22 }
 0x253   : > { %v1258_v26 = vmul.f32 %v1256_v60, %v1255_v42 }
 0x255   : > { %v1260_v51 = vadd.f32 %v1258_v26, %v1224_v48  ;;  %v3442_v48 = vld [vmem:[#allocation31_spill] sm:$0xff] }
 0x256   : > { %v3180_v14 = vpop.permute.xlu1 %1286  ;;  %v1294_v2 = vpop.permute.xlu0 %1293  ;;  %v1416_v38 = vmul.f32 %v3132_v6, %v3442_v48  ;;  %v1401_v48 = vstv %s3233_s21 }
 0x257   : > { %v1298_v10 = vmul.f32 %v1297_v29, %v1294_v2 }
 0x258   : > { %v1422_v5 = vrot.slane %v1416_v38, 6 }
 0x259   : > { %v1300_v22 = vadd.f32 %v1298_v10, %v1250_v55 }
 0x25a   : > { %v1296_v41 = vpop.permute.xlu1 %1295  ;;  %v1303_v44 = vpop.permute.xlu0 %1302  ;;  %v1424_v21 = vsel %vm897_vm5, %v1422_v5, %v3444_v58 }
 0x25b   : > { %v1307_v27 = vmul.f32 %v1306_v0, %v1303_v44  ;;  %v1299_v1 = vmul.f32 %v1297_v29, %v1296_v41  ;;  %v1288_v41 = vstv %s1711_s4  ;;  %s1526_s4 = sshll.u32 %s220_s30, 4  ;;  %s3286_s4 = int_to_ptr.vmem [resolvable:$true] %s1526_s4 }
 0x25c   : > { %v1289_v26 = vmul.f32 %v1288_v41, %v3178_v53  ;;  %v1290_v53 = vmul.f32 %v1288_v41, %v3180_v14  ;;  %v1469_v14 = vstv %s3235_s2  ;;  %v1487_v41 = vstv %s3252_s12  ;;  %s1880_s17 = scalar_lea.vmem %s3286_s4, 256 }
 0x25d   : > { %v1309_v8 = vadd.f32 %v1307_v27, %v1259_v19  ;;  %v1301_v62 = vadd.f32 %v1299_v1, %v1251_v24  ;;  %v1324_v19 = vstv %s3216_s23  ;;  %v1374_v27 = vstv %s3218_s28  ;;  %p1881_p12 = scmp.ne.s32.totalorder %s3286_s4, %s1880_s17 }
 0x25e   : > { %v1305_v7 = vpop.permute.xlu1 %1304  ;;  %v3184_v45 = vpop.permute.xlu0 %1311  ;;  %v1442_v1 = vstv %s3238_s7 }
 0x25f   : > { %v1308_v50 = vmul.f32 %v1306_v0, %v1305_v7  ;;  %v3189_v3 = vadd.f32 %v1347_v56, %v1309_v8  ;;  %v1291_v56 = vadd.f32 %v1289_v26, %v3171_v15  ;;  %v1392_v15 = vstv %s3230_s27  ;;  %p1882_p13 = pnand %p1881_p12, %p3446_p2 }
 0x261   : > { %v1310_v30 = vadd.f32 %v1308_v50, %v1260_v51  ;;  %v1315_v51 = vstv %s3224_s5  ;;  %s1513_s5 = scalar_lea.sflag [#allocation6], %s2151_s9  ;;  %p1883_p6 = pneg %p1882_p13 }
 0x262   : > { %v3191_v47 = vpop.permute.xlu1 %1313  ;;  %v1321_v59 = vpop.permute.xlu0 %1320  ;;  %v1316_v10 = vmul.f32 %v1315_v51, %v3184_v45 }
 0x263   : > { %v3194_v18 = vadd.f32 %v3441_v63, %v1310_v30  ;;  %v1325_v34 = vmul.f32 %v1324_v19, %v1321_v59  ;;  %v1460_v63 = vstv %s3226_s8  ;;  %v1365_v59 = vstv %s3228_s20  ;;  %s1980_s8 = smov [#allocation9]  }
 0x264   : > { %s1884_s20 = sshll.u32 %s1980_s8, 4  ;;  %s1885_s20 = int_to_ptr.vmem [resolvable:$false] %s1884_s20 }
 0x265   : > { %v1327_v29 = vadd.f32 %v1325_v34, %v1291_v56  ;;  %s1886_s27 = scalar_lea.vmem %s1885_s20, 512  ;;  %p1887_p0 = scmp.lt.s32.totalorder %s3286_s4, %s1885_s20 }
 0x266   : > { %v3196_v49 = vpop.permute.xlu1 %1322  ;;  %v1330_v43 = vpop.permute.xlu0 %1329  ;;  %p1888_p1 = scmp.lt.s32.totalorder %s1886_s27, %s1880_s17 }
 0x267   : > { %v1334_v25 = vmul.f32 %v1333_v61, %v1330_v43 }
 0x268   : > { %p1889_p9 = por %p1888_p1, %p1887_p0 }
 0x269   : > { %v1336_v37 = vadd.f32 %v1334_v25, %v1300_v22 }
 0x26a   : > { %v1332_v52 = vpop.permute.xlu1 %1331  ;;  %v3198_v36 = vpop.permute.xlu0 %1361  ;;  %p1890_p8 = pnand %p1889_p9, %p1883_p6 }
 0x26b   : > { %v1335_v40 = vmul.f32 %v1333_v61, %v1332_v52  ;;  %v1326_v52 = vmul.f32 %v1324_v19, %v3196_v49  ;;  %v1366_v22 = vmul.f32 %v1365_v59, %v3198_v36  ;;  %v1478_v49 = vstv %s3245_s11 }
 0x26d   : > { %v1337_v6 = vadd.f32 %v1335_v40, %v1301_v62 }
 0x26e   : > { %v3200_v20 = vpop.permute.xlu1 %1363  ;;  %v1371_v11 = vpop.permute.xlu0 %1370 }
 0x26f   : > { %v1375_v50 = vmul.f32 %v1374_v27, %v1371_v11  ;;  %v1292_v11 = vadd.f32 %v1290_v53, %v3176_v54 }
 0x271   : > { %v1377_v38 = vadd.f32 %v1375_v50, %v1327_v29  ;;  %v1328_v40 = vadd.f32 %v1326_v52, %v1292_v11 }
 0x272   : > { %v1373_v35 = vpop.permute.xlu1 %1372  ;;  %v1380_v4 = vpop.permute.xlu0 %1379 }
 0x273   : > { %v1384_v9 = vmul.f32 %v1383_v31, %v1380_v4  ;;  %v1376_v25 = vmul.f32 %v1374_v27, %v1373_v35  ;;  %v1451_v4 = vstv %s3243_s10 }
 0x275   : > { %v1386_v17 = vadd.f32 %v1384_v9, %v1336_v37  ;;  %v1378_v39 = vadd.f32 %v1376_v25, %v1328_v40 }
 0x276   : > { %v1382_v46 = vpop.permute.xlu1 %1381  ;;  %v3204_v12 = vpop.permute.xlu0 %1388 }
 0x277   : > { %v1385_v42 = vmul.f32 %v1383_v31, %v1382_v46  ;;  %v3209_v60 = vadd.f32 %v1424_v21, %v1386_v17  ;;  %v1318_v17 = vadd.f32 %v1316_v10, %v3169_v33  ;;  %v1317_v46 = vmul.f32 %v1315_v51, %v3191_v47 }
 0x278   : > { %v1393_v54 = vmul.f32 %v1392_v15, %v3204_v12 }
 0x279   : > { %v1387_v55 = vadd.f32 %v1385_v42, %v1337_v6  ;;  %v1368_v6 = vadd.f32 %v1366_v22, %v1318_v17  ;;  %v1367_v42 = vmul.f32 %v1365_v59, %v3200_v20  ;;  %v1319_v47 = vadd.f32 %v1317_v46, %v3174_v32 }
 0x27a   : > { %v3211_v2 = vpop.permute.xlu1 %1390  ;;  %v1398_v57 = vpop.permute.xlu0 %1397  ;;  %v1395_v12 = vadd.f32 %v1393_v54, %v3189_v3 }
 0x27b   : > { %v3214_v23 = vadd.f32 %v3445_v16, %v1387_v55  ;;  %v1402_v35 = vmul.f32 %v1401_v48, %v1398_v57  ;;  %v1394_v57 = vmul.f32 %v1392_v15, %v3211_v2 }
 0x27d   : > { %v1404_v27 = vadd.f32 %v1402_v35, %v1368_v6  ;;  %v1396_v3 = vadd.f32 %v1394_v57, %v3194_v18 }
 0x27e   : > { %v3220_v24 = vpop.permute.xlu1 %1399  ;;  %v1407_v0 = vpop.permute.xlu0 %1406 }
 0x27f   : > { %v1411_v61 = vmul.f32 %v1410_v28, %v1407_v0 }
 0x281   : > { %v1413_v9 = vadd.f32 %v1411_v61, %v1377_v38 }
 0x282   : > { %v1409_v44 = vpop.permute.xlu1 %1408  ;;  %v1439_v13 = vpop.permute.xlu0 %1438 }
 0x283   : > { %v1412_v62 = vmul.f32 %v1410_v28, %v1409_v44  ;;  %v1443_v55 = vmul.f32 %v1442_v1, %v1439_v13  ;;  %v1369_v28 = vadd.f32 %v1367_v42, %v1319_v47 }
 0x285   : > { %v1414_v44 = vadd.f32 %v1412_v62, %v1378_v39  ;;  %v1445_v56 = vadd.f32 %v1443_v55, %v1395_v12 }
 0x286   : > { %v3241_v8 = vpop.permute.xlu1 %1440  ;;  %v1448_v7 = vpop.permute.xlu0 %1447 }
 0x287   : > { %v1452_v19 = vmul.f32 %v1451_v4, %v1448_v7  ;;  %v1444_v53 = vmul.f32 %v1442_v1, %v3241_v8 }
 0x289   : > { %v1454_v50 = vadd.f32 %v1452_v19, %v1404_v27  ;;  %v1446_v61 = vadd.f32 %v1444_v53, %v1396_v3 }
 0x28a   : > { %v1450_v30 = vpop.permute.xlu1 %1449  ;;  %v1457_v43 = vpop.permute.xlu0 %1456 }
 0x28b   : > { %v1461_v31 = vmul.f32 %v1460_v63, %v1457_v43 }
 0x28d   : > { %v1463_v58 = vadd.f32 %v1461_v31, %v1413_v9 }
 0x28e   : > { %v1459_v5 = vpop.permute.xlu1 %1458  ;;  %v1466_v37 = vpop.permute.xlu0 %1465 }
 0x28f   : > { %v1470_v45 = vmul.f32 %v1469_v14, %v1466_v37  ;;  %v1462_v36 = vmul.f32 %v1460_v63, %v1459_v5  ;;  %v1453_v63 = vmul.f32 %v1451_v4, %v1450_v30 }
 0x291   : > { %v1472_v21 = vadd.f32 %v1470_v45, %v3209_v60  ;;  %v1403_v60 = vmul.f32 %v1401_v48, %v3220_v24  ;;  %v1464_v34 = vadd.f32 %v1462_v36, %v1414_v44 }
 0x292   : > { %v1468_v16 = vpop.permute.xlu1 %1467  ;;  %v1475_v0 = vpop.permute.xlu0 %1474 }
 0x293   : > { %v1494_v33 = vadd.f32 %v1472_v21, %v1463_v58  ;;  %v1471_v26 = vmul.f32 %v1469_v14, %v1468_v16  ;;  %v1479_v13 = vmul.f32 %v1478_v49, %v1475_v0  ;;  %v1405_v2 = vadd.f32 %v1403_v60, %v1369_v28 }
 0x295   : > { %v1473_v20 = vadd.f32 %v1471_v26, %v3214_v23  ;;  %v1481_v29 = vadd.f32 %v1479_v13, %v1445_v56  ;;  %v1455_v23 = vadd.f32 %v1453_v63, %v1405_v2 }
 0x296   : > { %v1477_v7 = vpop.permute.xlu1 %1476  ;;  %v1484_v51 = vpop.permute.xlu0 %1483 }
 0x297   : > { %v1495_v32 = vadd.f32 %v1473_v20, %v1464_v34  ;;  %v1488_v43 = vmul.f32 %v1487_v41, %v1484_v51  ;;  %v1480_v52 = vmul.f32 %v1478_v49, %v1477_v7 }
 0x299   : > { %v1490_v24 = vadd.f32 %v1488_v43, %v1454_v50  ;;  %v1482_v48 = vadd.f32 %v1480_v52, %v1446_v61 }
 0x29a   : > { %v1486_v59 = vpop.permute.xlu1 %1485 }
 0x29b   : > { %v1492_v10 = vadd.f32 %v1490_v24, %v1481_v29  ;;  %v1489_v15 = vmul.f32 %v1487_v41, %v1486_v59 }
 0x29d   : > { %v1496_v8 = vadd.f32 %v1494_v33, %v1492_v10  ;;  %v1491_v14 = vadd.f32 %v1489_v15, %v1455_v23 }
 0x29f   : > { %v1731_v11 = vmul.f32 -1.442695, %v1496_v8  ;;  %v1493_v30 = vadd.f32 %v1491_v14, %v1482_v48 }
 0x2a1   : > { %1825 = vpow2.f32 %v1731_v11  ;;  %v1497_v38 = vadd.f32 %v1495_v32, %v1493_v30 }
 0x2a3   : > { %v1732_v25 = vmul.f32 -1.442695, %v1497_v38 }
 0x2a5   : > { %1827 = vpow2.f32 %v1732_v25 }
 0x2ab   : > { %v1826_v18 = vpop.eup %1825 }
 0x2ac   : > { %v1504_v31 = vadd.f32 1.0, %v1826_v18 }
 0x2ae   : > { %1829 = vrcp.f32 %v1504_v31 }
 0x2af   : > { %v1828_v22 = vpop.eup %1827 }
 0x2b0   : > { %v1505_v1 = vadd.f32 1.0, %v1828_v22 }
 0x2b2   : > { %1831 = vrcp.f32 %v1505_v1 }
 0x2b8   : > { %v1830_v4 = vpop.eup %1829 }
 0x2b9   : > { %1510 = vst.msk [vmem:[%s220_s30] sm:$0xff] %vm230_vm0, %v1830_v4 }
 0x2bc   : > { %v1832_v5 = vpop.eup %1831 }
 0x2bd   : > { %1511 = vst.msk [vmem:[%s220_s30 + $0x8] sm:$0xff] %vm230_vm0, %v1832_v5 }
 0x2be   : > { %1893 = shalt.err (!%p1890_p8)
}
 0x2bf   : > { %s1894_s21 = scalar_lea.hbm %s3284_s13, 256  ;;  %s1898_s10 = scalar_lea.hbm %s3339_s3, 512 }
 0x2c0   : > { %p1895_p4 = scmp.ne.s32.totalorder %s3284_s13, %s1894_s21  ;;  %p1899_p5 = scmp.lt.u32.totalorder %s3284_s13, %s3339_s3 }
 0x2c1   : > { %p1900_p3 = scmp.lt.u32.totalorder %s1898_s10, %s1894_s21  ;;  %p1902_p12 = scmp.lt.u32.totalorder %s1894_s21, %s3284_s13 }
 0x2c2   : > { %p1896_p10 = pnand %p1895_p4, %p3446_p2 }
 0x2c3   : > { %p1901_p7 = por %p1900_p3, %p1899_p5 }
 0x2c4   : > { %p1897_p11 = pneg %p1896_p10 }
 0x2c5   : > { %p1903_p13 = por %p1902_p12, %p1901_p7 }
 0x2c7   : > { %p1904_p6 = pnand %p1903_p13, %p1897_p11 }
 0x2c9   : > { %1907 = shalt.err (!%p1904_p6)
}
 0x2ca   : > { %s1981_s22 = smov 128   ;;  %s1982_s24 = smov 8  }
 0x2cb   : > { %1746 = dma.vmem_to_hbm [thread:$0]  (%p3446_p2), %s3286_s4, 256, %s3284_s13, %s1513_s5, %s1981_s22, %s1981_s22, %s1982_s24  }
 0x2cc PF: > { %s1541_s30 = sand.u32 1, %s1946_s14   ;;  %p3447_p0 = scmp.ne.s32.totalorder %s3372_s26, 0 }
 0x2cd   : > { %p3448_p1 = scmp.ge.s32.totalorder %s1966_s19, 2  ;;  %s1542_s23 = scalar_lea.sflag [#allocation6], %s1541_s30 }
 0x2cf   : > { %p1757_p9 = pnand %p3448_p1, %p3447_p0 }
 0x2d1   : > { %1941 = dma.done.wait (!%p1757_p9), %s1542_s23, 256  }
 0x2d2   : > { %1943 = vsyncadd (!%p1757_p9), %s1542_s23, 4294967040  ;;  %s21_s19 = sadd.s32 1, %s1966_s19   ;;  %s3449_s14 = smov %s1950_s15 }
 0x2d3   : > { %p18_p8 = scmp.ge.s32.totalorder %s21_s19, 4   ;;  %s3450_s15 = smov %s1954_s16 }
 0x2d4   : > { %s3451_s16 = smov %s2116_s29  ;;  %s3452_s17 = smov %s1962_s18 }
 0x2d5   : > { %s3453_s18 = smov %s3455_s6  ;;  %20 = sbr.rel (!%p18_p8) target bundleno = 9 (0x9), region = 97 }
 0x2dc   :  { %1547 = vsyncpa [#allocation5], 1 }
 0x2dd   :  { %1549 = vsyncpa [#allocation5 + $0x1], 1 }
 0x2de   :  { %1550 = vsyncpa [#allocation6], 1 }
 0x2df   :  { %1552 = vsyncpa [#allocation6 + $0x1], 1 }
 0x2e0   :  { %1553 = vsyncpa [#allocation7], 1 }
 0x2e1   :  { %1555 = vsyncpa [#allocation7 + $0x1], 1 }

</bundles_post_ra>
